<compile_context>
chip_gen: v7x
topology: tpu7x:2x2x1
jax: 0.10.0
libtpu: 0.0.40
codegen_flags: <defaults>
</compile_context>

<pallas_src>
import functools

import jax
import jax.numpy as jnp
from jax import lax
from jax.experimental import pallas as pl
from jax.experimental.pallas import tpu as pltpu

EPS = 1e-5          # nn.BatchNorm2d default eps
NEG_SLOPE = 0.1     # leaky_relu negative_slope
SUBLANE = 8         # f32 sublane tile

# Tap order t = (oy + 1) * 3 + (ox + 1)  (matches the weight re-layout below).
_OFFSETS = tuple((oy, ox) for oy in (-1, 0, 1) for ox in (-1, 0, 1))


# --------------------------------------------------------------------------
# In-kernel helpers
# --------------------------------------------------------------------------
def _conv3x3(z, w_ref, m_ref, W, HW):
    """3x3 'same' conv of one image (no bias; BN makes the bias redundant).

    z:     (Cp, HW) f32 activations, H*W on the lane axis.
    w_ref: (9, Cp, Cp) tap-major weight Ref (resident VMEM constant).
    m_ref: (9, 1, HW)  host-precomputed 0/1 boundary masks (VMEM constant).

    Nine accumulating MXU dots over rolled+masked taps: no (9*Cp, HW) im2col
    concatenate is ever materialized (chunked-K accumulation).
    """
    acc = None
    for t, (oy, ox) in enumerate(_OFFSETS):
        if oy == 0 and ox == 0:
            tap = z
        else:
            # tap[p] = z[p + oy*W + ox]   (roll semantics: out[i] = in[i - s])
            shift = (-(oy * W + ox)) % HW
            tap = pltpu.roll(z, shift=shift, axis=1) * m_ref[t]
        part = jnp.dot(w_ref[t], tap, preferred_element_type=jnp.float32)
        acc = part if acc is None else acc + part
    return acc


def _partial_stats(y, inv_hw):
    """Per-channel (sum, centered M2) for one image — numerically stable."""
    s = jnp.sum(y, axis=1, keepdims=True)            # (Cp, 1)
    d = y - s * inv_hw
    m2 = jnp.sum(d * d, axis=1, keepdims=True)       # (Cp, 1)
    return s, m2


# --------------------------------------------------------------------------
# Kernels
# --------------------------------------------------------------------------
def _conv_stats_kernel(x_ref, w_ref, m_ref, y_ref, st_ref, *, W, HW, G):
    """Pass 1: y = conv3x3(x) plus packed partial BN statistics of y."""
    inv_hw = 1.0 / HW
    for g in range(G):
        y = _conv3x3(x_ref[g], w_ref, m_ref, W, HW)
        y_ref[g] = y
        s, m2 = _partial_stats(y, inv_hw)
        st_ref[g, :, 0:1] = s
        st_ref[g, :, 1:2] = m2


def _bn_act_conv_stats_kernel(x_ref, scale_ref, shift_ref, w_ref, m_ref,
                              y_ref, st_ref, *, W, HW, G):
    """Pass 2: bn1 + leaky_relu + conv3x3, plus packed partial BN statistics."""
    inv_hw = 1.0 / HW
    scale = scale_ref[...]                            # (Cp, 1)
    shift = shift_ref[...]
    for g in range(G):
        z = x_ref[g] * scale + shift
        z = jnp.where(z > 0, z, NEG_SLOPE * z)
        y = _conv3x3(z, w_ref, m_ref, W, HW)
        y_ref[g] = y
        s, m2 = _partial_stats(y, inv_hw)
        st_ref[g, :, 0:1] = s
        st_ref[g, :, 1:2] = m2


def _bn_act_kernel(x_ref, scale_ref, shift_ref, o_ref, *, G):
    """Pass 3: bn2 + leaky_relu (pointwise, lane-dense)."""
    scale = scale_ref[...]
    shift = shift_ref[...]
    for g in range(G):
        z = x_ref[g] * scale + shift
        o_ref[g] = jnp.where(z > 0, z, NEG_SLOPE * z)


# --------------------------------------------------------------------------
# Host-side glue
# --------------------------------------------------------------------------
def _merge_bn_stats(st, gamma, beta, hw):
    """Merge per-image (sum, centered M2) into global biased mean/var (Chan's
    parallel variance) and fold gamma/beta into per-channel scale/shift."""
    sums = st[:, :, 0]                                # (N, Cp)
    m2s = st[:, :, 1]                                 # (N, Cp)
    n_img = sums.shape[0]
    total = n_img * hw
    mean = jnp.sum(sums, axis=0) / total              # (Cp,)
    img_mean = sums / hw
    m2 = jnp.sum(m2s, axis=0) + hw * jnp.sum((img_mean - mean[None, :]) ** 2,
                                             axis=0)
    var = m2 / total                                  # biased (BN train mode)
    scale = gamma * lax.rsqrt(var + EPS)
    shift = beta - mean * scale
    return scale.reshape(-1, 1), shift.reshape(-1, 1)  # (Cp, 1)


def _pick_images_per_step(n, cp, hw):
    """Largest divisor of n (<=8) whose per-step footprint stays well inside a
    conservative VMEM budget (in/out double-buffered + acc + taps ~ 6x)."""
    per_image = cp * hw * 4
    for cand in (8, 4, 2):
        if n % cand == 0 and cand * per_image * 6 <= 16 * 1024 * 1024:
            return cand
    return 1


def residual_forward(x_nchw, params, *, vmem_limit_mb=32):
    """Forward pass matching the torch Residual module. x_nchw: (N,C,H,W) f32.

    vmem_limit_mb can be raised (64-100) on v5e/v6e (128 MiB VMEM) to allow
    larger image blocks; keep <=32 on v7x (64 MiB per-TC VMEM).
    """
    N, C, H, W = x_nchw.shape
    HW = H * W
    Cp = ((C + SUBLANE - 1) // SUBLANE) * SUBLANE
    # Conv biases b1/b2 are intentionally unused inside the kernels: training-
    # mode BatchNorm directly follows each conv and is exactly invariant to a
    # per-channel constant shift -> identical final output, less VPU/DMA work.
    w1, _b1, g1, be1, w2, _b2, g2, be2 = params

    # (N, C, H, W) -> (N, Cp, H*W): free reshape + tiny channel pad (no
    # transpose, no spatial padding through XLA/HBM).
    x = x_nchw.reshape(N, C, HW).astype(jnp.float32)
    if Cp != C:
        x = jnp.pad(x, ((0, 0), (0, Cp - C), (0, 0)))

    def prep_w(w):
        # torch (Cout, Cin, 3, 3) -> tap-major (9, Cp, Cp), tap t = ky*3 + kx.
        # TODO(synk): cast weights (and in-kernel taps) to bf16 for the ~3-4x
        # MXU rate on v6e/v7x if the accuracy budget allows.
        w = jnp.transpose(w.astype(jnp.float32), (2, 3, 0, 1))  # (ky,kx,Cout,Cin)
        w = w.reshape(9, C, C)
        return jnp.pad(w, ((0, 0), (0, Cp - C), (0, Cp - C)))

    pad1 = lambda v, cv=0.0: jnp.pad(v.astype(jnp.float32), (0, Cp - C),
                                     constant_values=cv)

    w1k, w2k = prep_w(w1), prep_w(w2)
    g1p, g2p = pad1(g1, 1.0), pad1(g2, 1.0)
    be1p, be2p = pad1(be1), pad1(be2)

    # Host-precomputed 3x3 boundary masks: grid-invariant, live in VMEM once.
    pos = jnp.arange(HW, dtype=jnp.int32)
    row, col = pos // W, pos % W
    masks = jnp.stack(
        [((row + oy >= 0) & (row + oy < H) &
          (col + ox >= 0) & (col + ox < W)).astype(jnp.float32)
         for oy, ox in _OFFSETS], axis=0).reshape(9, 1, HW)

    # TODO(synk): for very large per-image Cp*HW (e.g. 224x224, Cp>=256),
    # additionally tile over H rows with a 2-row halo; at SimCLR/CIFAR scale
    # whole images (G per step) fit comfortably.
    G = _pick_images_per_step(N, Cp, HW)
    grid = (N // G,)

    img_spec = pl.BlockSpec((G, Cp, HW), lambda n: (n, 0, 0))
    st_spec = pl.BlockSpec((G, Cp, 2), lambda n: (n, 0, 0))
    # Grid-invariant operands: constant index_map + single buffer (double
    # buffering a block that never changes is pure VMEM waste).
    const1 = pl.Buffered(1)
    w_spec = pl.BlockSpec((9, Cp, Cp), lambda n: (0, 0, 0), pipeline_mode=const1)
    m_spec = pl.BlockSpec((9, 1, HW), lambda n: (0, 0, 0), pipeline_mode=const1)
    col_spec = pl.BlockSpec((Cp, 1), lambda n: (0, 0), pipeline_mode=const1)

    # TODO(synk): on v7x, verify the batch axis actually splits across the two
    # TensorCores; switch to pltpu.CORE_PARALLEL / an explicit core split if
    # profiling shows one TC idle.
    cparams = pltpu.CompilerParams(
        dimension_semantics=("parallel",),
        vmem_limit_bytes=vmem_limit_mb * 1024 * 1024)

    y_shape = jax.ShapeDtypeStruct((N, Cp, HW), jnp.float32)
    st_shape = jax.ShapeDtypeStruct((N, Cp, 2), jnp.float32)

    # ---- Pass 1: conv1 (+ per-image partial BN1 statistics) ---------------
    y1, st1 = pl.pallas_call(
        functools.partial(_conv_stats_kernel, W=W, HW=HW, G=G),
        out_shape=(y_shape, st_shape),
        grid_spec=pltpu.PrefetchScalarGridSpec(
            num_scalar_prefetch=0, grid=grid,
            in_specs=[img_spec, w_spec, m_spec],
            out_specs=(img_spec, st_spec)),
        compiler_params=cparams,
    )(x, w1k, masks)

    scale1, shift1 = _merge_bn_stats(st1, g1p, be1p, HW)

    # ---- Pass 2: bn1 + leaky_relu + conv2 (+ partial BN2 statistics) -------
    # TODO(synk): y1/y2 could be stored as bf16 to halve HBM traffic of the
    # two largest streams (accuracy-dependent vs the f32 torch reference).
    y2, st2 = pl.pallas_call(
        functools.partial(_bn_act_conv_stats_kernel, W=W, HW=HW, G=G),
        out_shape=(y_shape, st_shape),
        grid_spec=pltpu.PrefetchScalarGridSpec(
            num_scalar_prefetch=0, grid=grid,
            in_specs=[img_spec, col_spec, col_spec, w_spec, m_spec],
            out_specs=(img_spec, st_spec)),
        compiler_params=cparams,
    )(y1, scale1, shift1, w2k, masks)

    scale2, shift2 = _merge_bn_stats(st2, g2p, be2p, HW)

    # ---- Pass 3: bn2 + leaky_relu ------------------------------------------
    out = pl.pallas_call(
        functools.partial(_bn_act_kernel, G=G),
        out_shape=y_shape,
        grid_spec=pltpu.PrefetchScalarGridSpec(
            num_scalar_prefetch=0, grid=grid,
            in_specs=[img_spec, col_spec, col_spec],
            out_specs=img_spec),
        compiler_params=cparams,
    )(y2, scale2, shift2)

    return out[:, :C, :].reshape(N, C, H, W)


# --------------------------------------------------------------------------
# Pure-JAX reference and test harness
# --------------------------------------------------------------------------
def _reference(x_nchw, params):
    """Pure-JAX reference with identical semantics (for validation)."""
    w1, b1, g1, be1, w2, b2, g2, be2 = params

    def block(x, w, b, g, be):
        y = lax.conv_general_dilated(
            x, w, window_strides=(1, 1), padding=((1, 1), (1, 1)),
            dimension_numbers=('NCHW', 'OIHW', 'NCHW'))
        y = y + b.reshape(1, -1, 1, 1)
        mean = jnp.mean(y, axis=(0, 2, 3), keepdims=True)
        var = jnp.var(y, axis=(0, 2, 3), keepdims=True)    # biased, like BN
        y = (y - mean) / jnp.sqrt(var + EPS)
        y = y * g.reshape(1, -1, 1, 1) + be.reshape(1, -1, 1, 1)
        return jnp.where(y > 0, y, NEG_SLOPE * y)

    return block(block(x_nchw, w1, b1, g1, be1), w2, b2, g2, be2)


def _init_params(key, channels):
    """Deterministic synthetic parameters (shapes match the torch module)."""
    ks = jax.random.split(key, 8)
    fan_in = channels * 3 * 3
    bound = 1.0 / jnp.sqrt(fan_in)
    w1 = jax.random.uniform(ks[0], (channels, channels, 3, 3), jnp.float32, -bound, bound)
    b1 = jax.random.uniform(ks[1], (channels,), jnp.float32, -bound, bound)
    g1 = 1.0 + 0.1 * jax.random.normal(ks[2], (channels,), jnp.float32)
    be1 = 0.1 * jax.random.normal(ks[3], (channels,), jnp.float32)
    w2 = jax.random.uniform(ks[4], (channels, channels, 3, 3), jnp.float32, -bound, bound)
    b2 = jax.random.uniform(ks[5], (channels,), jnp.float32, -bound, bound)
    g2 = 1.0 + 0.1 * jax.random.normal(ks[6], (channels,), jnp.float32)
    be2 = 0.1 * jax.random.normal(ks[7], (channels,), jnp.float32)
    return (w1, b1, g1, be1, w2, b2, g2, be2)


if __name__ == "__main__":
    # TODO(synk): training-mode BatchNorm running-stat buffer updates
    # (running_mean/var, num_batches_tracked) are torch-module side effects and
    # are not emitted here.
    key = jax.random.PRNGKey(0)
    k_x, k_p = jax.random.split(key)

    N, C, H, W = 2, 4, 16, 16
    x = jax.random.normal(k_x, (N, C, H, W), jnp.float32)
    params = _init_params(k_p, C)

    forward = jax.jit(residual_forward)
    out = jax.block_until_ready(forward(x, params))
    ref = jax.block_until_ready(_reference(x, params))

    assert out.shape == (N, C, H, W), out.shape
    max_err = float(jnp.max(jnp.abs(out - ref)))
    assert jnp.allclose(out, ref, rtol=1e-3, atol=1e-3), max_err
    print("KERNEL_OK")
</pallas_src>

<mosaic_0001>
module attributes {stable_mosaic.version = 11 : i64} {
  func.func @_bn_act_kernel(%arg0: i32, %arg1: memref<2x8x256xf32, #tpu.memory_space<vmem>>, %arg2: memref<8x1xf32, #tpu.memory_space<vmem>>, %arg3: memref<8x1xf32, #tpu.memory_space<vmem>>, %arg4: memref<2x8x256xf32, #tpu.memory_space<vmem>>) attributes {dimension_semantics = [#tpu.dimension_semantics<parallel>], iteration_bounds = array<i64: 1>, scalar_prefetch = 0 : i64, scratch_operands = 0 : i64, tpu.core_type = #tpu.core_type<tc>, window_params = [{transform_indices = @transform_0, window_bounds = array<i64: 2, 8, 256>}, {pipeline_mode = #tpu.pipeline_mode<synchronous>, transform_indices = @transform_1, window_bounds = array<i64: 8, 1>}, {pipeline_mode = #tpu.pipeline_mode<synchronous>, transform_indices = @transform_2, window_bounds = array<i64: 8, 1>}, {transform_indices = @transform_3, window_bounds = array<i64: 2, 8, 256>}]} {
    %c0 = arith.constant 0 : index
    %c0_0 = arith.constant 0 : index
    %0 = vector.load %arg2[%c0, %c0_0] : memref<8x1xf32, #tpu.memory_space<vmem>>, vector<8x1xf32>
    %c0_1 = arith.constant 0 : index
    %c0_2 = arith.constant 0 : index
    %1 = vector.load %arg3[%c0_1, %c0_2] : memref<8x1xf32, #tpu.memory_space<vmem>>, vector<8x1xf32>
    %c0_3 = arith.constant 0 : index
    %c0_4 = arith.constant 0 : index
    %c0_5 = arith.constant 0 : index
    %2 = vector.load %arg1[%c0_3, %c0_4, %c0_5] : memref<2x8x256xf32, #tpu.memory_space<vmem>>, vector<1x8x256xf32>
    %3 = vector.shape_cast %2 : vector<1x8x256xf32> to vector<8x256xf32>
    %4 = vector.broadcast %0 : vector<8x1xf32> to vector<8x256xf32>
    %5 = arith.mulf %3, %4 : vector<8x256xf32>
    %6 = vector.broadcast %1 : vector<8x1xf32> to vector<8x256xf32>
    %7 = arith.addf %5, %6 : vector<8x256xf32>
    %cst = arith.constant 0.000000e+00 : f32
    %8 = vector.broadcast %cst : f32 to vector<8x256xf32>
    %9 = arith.cmpf ogt, %7, %8 : vector<8x256xf32>
    %cst_6 = arith.constant 1.000000e-01 : f32
    %10 = vector.broadcast %cst_6 : f32 to vector<8x256xf32>
    %11 = arith.mulf %10, %7 : vector<8x256xf32>
    %12 = arith.select %9, %7, %11 : vector<8x256xi1>, vector<8x256xf32>
    %c0_7 = arith.constant 0 : index
    %c0_8 = arith.constant 0 : index
    %c0_9 = arith.constant 0 : index
    %13 = vector.load %arg4[%c0_7, %c0_8, %c0_9] : memref<2x8x256xf32, #tpu.memory_space<vmem>>, vector<1x8x256xf32>
    %14 = vector.shape_cast %13 : vector<1x8x256xf32> to vector<8x256xf32>
    %15 = vector.shape_cast %12 : vector<8x256xf32> to vector<1x8x256xf32>
    tpu.vector_store %arg4[%c0_7, %c0_8, %c0_9], %15 {strides = array<i32>} : memref<2x8x256xf32, #tpu.memory_space<vmem>>, vector<1x8x256xf32>,
    %c1 = arith.constant 1 : index
    %c0_10 = arith.constant 0 : index
    %c0_11 = arith.constant 0 : index
    %16 = vector.load %arg1[%c1, %c0_10, %c0_11] : memref<2x8x256xf32, #tpu.memory_space<vmem>>, vector<1x8x256xf32>
    %17 = vector.shape_cast %16 : vector<1x8x256xf32> to vector<8x256xf32>
    %18 = vector.broadcast %0 : vector<8x1xf32> to vector<8x256xf32>
    %19 = arith.mulf %17, %18 : vector<8x256xf32>
    %20 = vector.broadcast %1 : vector<8x1xf32> to vector<8x256xf32>
    %21 = arith.addf %19, %20 : vector<8x256xf32>
    %cst_12 = arith.constant 0.000000e+00 : f32
    %22 = vector.broadcast %cst_12 : f32 to vector<8x256xf32>
    %23 = arith.cmpf ogt, %21, %22 : vector<8x256xf32>
    %cst_13 = arith.constant 1.000000e-01 : f32
    %24 = vector.broadcast %cst_13 : f32 to vector<8x256xf32>
    %25 = arith.mulf %24, %21 : vector<8x256xf32>
    %26 = arith.select %23, %21, %25 : vector<8x256xi1>, vector<8x256xf32>
    %c1_14 = arith.constant 1 : index
    %c0_15 = arith.constant 0 : index
    %c0_16 = arith.constant 0 : index
    %27 = vector.load %arg4[%c1_14, %c0_15, %c0_16] : memref<2x8x256xf32, #tpu.memory_space<vmem>>, vector<1x8x256xf32>
    %28 = vector.shape_cast %27 : vector<1x8x256xf32> to vector<8x256xf32>
    %29 = vector.shape_cast %26 : vector<8x256xf32> to vector<1x8x256xf32>
    tpu.vector_store %arg4[%c1_14, %c0_15, %c0_16], %29 {strides = array<i32>} : memref<2x8x256xf32, #tpu.memory_space<vmem>>, vector<1x8x256xf32>,
    return
  }
  func.func @transform_0(%arg0: i32) -> (i32, i32, i32) {
    %c0_i32 = arith.constant 0 : i32
    %c0_i32_0 = arith.constant 0 : i32
    %c0_i32_1 = arith.constant 0 : i32
    return %arg0, %c0_i32, %c0_i32_0 : i32, i32, i32
  }
  func.func @transform_1(%arg0: i32) -> (i32, i32) {
    %c0_i32 = arith.constant 0 : i32
    %c0_i32_0 = arith.constant 0 : i32
    %c0_i32_1 = arith.constant 0 : i32
    return %c0_i32, %c0_i32_0 : i32, i32
  }
  func.func @transform_2(%arg0: i32) -> (i32, i32) {
    %c0_i32 = arith.constant 0 : i32
    %c0_i32_0 = arith.constant 0 : i32
    %c0_i32_1 = arith.constant 0 : i32
    return %c0_i32, %c0_i32_0 : i32, i32
  }
  func.func @transform_3(%arg0: i32) -> (i32, i32, i32) {
    %c0_i32 = arith.constant 0 : i32
    %c0_i32_0 = arith.constant 0 : i32
    %c0_i32_1 = arith.constant 0 : i32
    return %arg0, %c0_i32, %c0_i32_0 : i32, i32, i32
  }
}

module attributes {stable_mosaic.version = 11 : i64} {
  func.func @_bn_act_conv_stats_kernel(%arg0: i32, %arg1: memref<2x8x256xf32, #tpu.memory_space<vmem>>, %arg2: memref<8x1xf32, #tpu.memory_space<vmem>>, %arg3: memref<8x1xf32, #tpu.memory_space<vmem>>, %arg4: memref<9x8x8xf32, #tpu.memory_space<vmem>>, %arg5: memref<9x1x256xf32, #tpu.memory_space<vmem>>, %arg6: memref<2x8x256xf32, #tpu.memory_space<vmem>>, %arg7: memref<2x8x2xf32, #tpu.memory_space<vmem>>) attributes {dimension_semantics = [#tpu.dimension_semantics<parallel>], iteration_bounds = array<i64: 1>, scalar_prefetch = 0 : i64, scratch_operands = 0 : i64, tpu.core_type = #tpu.core_type<tc>, window_params = [{transform_indices = @transform_0, window_bounds = array<i64: 2, 8, 256>}, {pipeline_mode = #tpu.pipeline_mode<synchronous>, transform_indices = @transform_1, window_bounds = array<i64: 8, 1>}, {pipeline_mode = #tpu.pipeline_mode<synchronous>, transform_indices = @transform_2, window_bounds = array<i64: 8, 1>}, {pipeline_mode = #tpu.pipeline_mode<synchronous>, transform_indices = @transform_3, window_bounds = array<i64: 9, 8, 8>}, {pipeline_mode = #tpu.pipeline_mode<synchronous>, transform_indices = @transform_4, window_bounds = array<i64: 9, 1, 256>}, {transform_indices = @transform_5, window_bounds = array<i64: 2, 8, 256>}, {transform_indices = @transform_6, window_bounds = array<i64: 2, 8, 2>}]} {
    %c0 = arith.constant 0 : index
    %c0_0 = arith.constant 0 : index
    %0 = vector.load %arg2[%c0, %c0_0] : memref<8x1xf32, #tpu.memory_space<vmem>>, vector<8x1xf32>
    %c0_1 = arith.constant 0 : index
    %c0_2 = arith.constant 0 : index
    %1 = vector.load %arg3[%c0_1, %c0_2] : memref<8x1xf32, #tpu.memory_space<vmem>>, vector<8x1xf32>
    %c0_3 = arith.constant 0 : index
    %c0_4 = arith.constant 0 : index
    %c0_5 = arith.constant 0 : index
    %2 = vector.load %arg1[%c0_3, %c0_4, %c0_5] : memref<2x8x256xf32, #tpu.memory_space<vmem>>, vector<1x8x256xf32>
    %3 = vector.shape_cast %2 : vector<1x8x256xf32> to vector<8x256xf32>
    %4 = vector.broadcast %0 : vector<8x1xf32> to vector<8x256xf32>
    %5 = arith.mulf %3, %4 : vector<8x256xf32>
    %6 = vector.broadcast %1 : vector<8x1xf32> to vector<8x256xf32>
    %7 = arith.addf %5, %6 : vector<8x256xf32>
    %cst = arith.constant 0.000000e+00 : f32
    %8 = vector.broadcast %cst : f32 to vector<8x256xf32>
    %9 = arith.cmpf ogt, %7, %8 : vector<8x256xf32>
    %cst_6 = arith.constant 1.000000e-01 : f32
    %10 = vector.broadcast %cst_6 : f32 to vector<8x256xf32>
    %11 = arith.mulf %10, %7 : vector<8x256xf32>
    %12 = arith.select %9, %7, %11 : vector<8x256xi1>, vector<8x256xf32>
    %c17_i32 = arith.constant 17 : i32
    %13 = tpu.dynamic_rotate %12 by %c17_i32 dim 1 : vector<8x256xf32>, i32 -> vector<8x256xf32>
    %c0_7 = arith.constant 0 : index
    %c0_8 = arith.constant 0 : index
    %c0_9 = arith.constant 0 : index
    %14 = vector.load %arg5[%c0_7, %c0_8, %c0_9] : memref<9x1x256xf32, #tpu.memory_space<vmem>>, vector<1x1x256xf32>
    %15 = vector.shape_cast %14 : vector<1x1x256xf32> to vector<1x256xf32>
    %16 = vector.broadcast %15 : vector<1x256xf32> to vector<8x256xf32>
    %17 = arith.mulf %13, %16 : vector<8x256xf32>
    %c0_10 = arith.constant 0 : index
    %c0_11 = arith.constant 0 : index
    %c0_12 = arith.constant 0 : index
    %18 = vector.load %arg4[%c0_10, %c0_11, %c0_12] : memref<9x8x8xf32, #tpu.memory_space<vmem>>, vector<1x8x8xf32>
    %19 = vector.shape_cast %18 : vector<1x8x8xf32> to vector<8x8xf32>
    %cst_13 = arith.constant dense<0.000000e+00> : vector<8x256xf32>
    %20 = tpu.matmul %19, %17, %cst_13 {dimension_numbers = #tpu.dot_dimension_numbers<[1], [0], [0], [1], [0, 0, 1, 1], [], []>} : vector<8x8xf32>, vector<8x256xf32>, vector<8x256xf32> -> vector<8x256xf32>
    %c16_i32 = arith.constant 16 : i32
    %21 = tpu.dynamic_rotate %12 by %c16_i32 dim 1 : vector<8x256xf32>, i32 -> vector<8x256xf32>
    %c1 = arith.constant 1 : index
    %c0_14 = arith.constant 0 : index
    %c0_15 = arith.constant 0 : index
    %22 = vector.load %arg5[%c1, %c0_14, %c0_15] : memref<9x1x256xf32, #tpu.memory_space<vmem>>, vector<1x1x256xf32>
    %23 = vector.shape_cast %22 : vector<1x1x256xf32> to vector<1x256xf32>
    %24 = vector.broadcast %23 : vector<1x256xf32> to vector<8x256xf32>
    %25 = arith.mulf %21, %24 : vector<8x256xf32>
    %c1_16 = arith.constant 1 : index
    %c0_17 = arith.constant 0 : index
    %c0_18 = arith.constant 0 : index
    %26 = vector.load %arg4[%c1_16, %c0_17, %c0_18] : memref<9x8x8xf32, #tpu.memory_space<vmem>>, vector<1x8x8xf32>
    %27 = vector.shape_cast %26 : vector<1x8x8xf32> to vector<8x8xf32>
    %cst_19 = arith.constant dense<0.000000e+00> : vector<8x256xf32>
    %28 = tpu.matmul %27, %25, %cst_19 {dimension_numbers = #tpu.dot_dimension_numbers<[1], [0], [0], [1], [0, 0, 1, 1], [], []>} : vector<8x8xf32>, vector<8x256xf32>, vector<8x256xf32> -> vector<8x256xf32>
    %29 = arith.addf %20, %28 : vector<8x256xf32>
    %c15_i32 = arith.constant 15 : i32
    %30 = tpu.dynamic_rotate %12 by %c15_i32 dim 1 : vector<8x256xf32>, i32 -> vector<8x256xf32>
    %c2 = arith.constant 2 : index
    %c0_20 = arith.constant 0 : index
    %c0_21 = arith.constant 0 : index
    %31 = vector.load %arg5[%c2, %c0_20, %c0_21] : memref<9x1x256xf32, #tpu.memory_space<vmem>>, vector<1x1x256xf32>
    %32 = vector.shape_cast %31 : vector<1x1x256xf32> to vector<1x256xf32>
    %33 = vector.broadcast %32 : vector<1x256xf32> to vector<8x256xf32>
    %34 = arith.mulf %30, %33 : vector<8x256xf32>
    %c2_22 = arith.constant 2 : index
    %c0_23 = arith.constant 0 : index
    %c0_24 = arith.constant 0 : index
    %35 = vector.load %arg4[%c2_22, %c0_23, %c0_24] : memref<9x8x8xf32, #tpu.memory_space<vmem>>, vector<1x8x8xf32>
    %36 = vector.shape_cast %35 : vector<1x8x8xf32> to vector<8x8xf32>
    %cst_25 = arith.constant dense<0.000000e+00> : vector<8x256xf32>
    %37 = tpu.matmul %36, %34, %cst_25 {dimension_numbers = #tpu.dot_dimension_numbers<[1], [0], [0], [1], [0, 0, 1, 1], [], []>} : vector<8x8xf32>, vector<8x256xf32>, vector<8x256xf32> -> vector<8x256xf32>
    %38 = arith.addf %29, %37 : vector<8x256xf32>
    %c1_i32 = arith.constant 1 : i32
    %39 = tpu.dynamic_rotate %12 by %c1_i32 dim 1 : vector<8x256xf32>, i32 -> vector<8x256xf32>
    %c3 = arith.constant 3 : index
    %c0_26 = arith.constant 0 : index
    %c0_27 = arith.constant 0 : index
    %40 = vector.load %arg5[%c3, %c0_26, %c0_27] : memref<9x1x256xf32, #tpu.memory_space<vmem>>, vector<1x1x256xf32>
    %41 = vector.shape_cast %40 : vector<1x1x256xf32> to vector<1x256xf32>
    %42 = vector.broadcast %41 : vector<1x256xf32> to vector<8x256xf32>
    %43 = arith.mulf %39, %42 : vector<8x256xf32>
    %c3_28 = arith.constant 3 : index
    %c0_29 = arith.constant 0 : index
    %c0_30 = arith.constant 0 : index
    %44 = vector.load %arg4[%c3_28, %c0_29, %c0_30] : memref<9x8x8xf32, #tpu.memory_space<vmem>>, vector<1x8x8xf32>
    %45 = vector.shape_cast %44 : vector<1x8x8xf32> to vector<8x8xf32>
    %cst_31 = arith.constant dense<0.000000e+00> : vector<8x256xf32>
    %46 = tpu.matmul %45, %43, %cst_31 {dimension_numbers = #tpu.dot_dimension_numbers<[1], [0], [0], [1], [0, 0, 1, 1], [], []>} : vector<8x8xf32>, vector<8x256xf32>, vector<8x256xf32> -> vector<8x256xf32>
    %47 = arith.addf %38, %46 : vector<8x256xf32>
    %c4 = arith.constant 4 : index
    %c0_32 = arith.constant 0 : index
    %c0_33 = arith.constant 0 : index
    %48 = vector.load %arg4[%c4, %c0_32, %c0_33] : memref<9x8x8xf32, #tpu.memory_space<vmem>>, vector<1x8x8xf32>
    %49 = vector.shape_cast %48 : vector<1x8x8xf32> to vector<8x8xf32>
    %cst_34 = arith.constant dense<0.000000e+00> : vector<8x256xf32>
    %50 = tpu.matmul %49, %12, %cst_34 {dimension_numbers = #tpu.dot_dimension_numbers<[1], [0], [0], [1], [0, 0, 1, 1], [], []>} : vector<8x8xf32>, vector<8x256xf32>, vector<8x256xf32> -> vector<8x256xf32>
    %51 = arith.addf %47, %50 : vector<8x256xf32>
    %c255_i32 = arith.constant 255 : i32
    %52 = tpu.dynamic_rotate %12 by %c255_i32 dim 1 : vector<8x256xf32>, i32 -> vector<8x256xf32>
    %c5 = arith.constant 5 : index
    %c0_35 = arith.constant 0 : index
    %c0_36 = arith.constant 0 : index
    %53 = vector.load %arg5[%c5, %c0_35, %c0_36] : memref<9x1x256xf32, #tpu.memory_space<vmem>>, vector<1x1x256xf32>
    %54 = vector.shape_cast %53 : vector<1x1x256xf32> to vector<1x256xf32>
    %55 = vector.broadcast %54 : vector<1x256xf32> to vector<8x256xf32>
    %56 = arith.mulf %52, %55 : vector<8x256xf32>
    %c5_37 = arith.constant 5 : index
    %c0_38 = arith.constant 0 : index
    %c0_39 = arith.constant 0 : index
    %57 = vector.load %arg4[%c5_37, %c0_38, %c0_39] : memref<9x8x8xf32, #tpu.memory_space<vmem>>, vector<1x8x8xf32>
    %58 = vector.shape_cast %57 : vector<1x8x8xf32> to vector<8x8xf32>
    %cst_40 = arith.constant dense<0.000000e+00> : vector<8x256xf32>
    %59 = tpu.matmul %58, %56, %cst_40 {dimension_numbers = #tpu.dot_dimension_numbers<[1], [0], [0], [1], [0, 0, 1, 1], [], []>} : vector<8x8xf32>, vector<8x256xf32>, vector<8x256xf32> -> vector<8x256xf32>
    %60 = arith.addf %51, %59 : vector<8x256xf32>
    %c241_i32 = arith.constant 241 : i32
    %61 = tpu.dynamic_rotate %12 by %c241_i32 dim 1 : vector<8x256xf32>, i32 -> vector<8x256xf32>
    %c6 = arith.constant 6 : index
    %c0_41 = arith.constant 0 : index
    %c0_42 = arith.constant 0 : index
    %62 = vector.load %arg5[%c6, %c0_41, %c0_42] : memref<9x1x256xf32, #tpu.memory_space<vmem>>, vector<1x1x256xf32>
    %63 = vector.shape_cast %62 : vector<1x1x256xf32> to vector<1x256xf32>
    %64 = vector.broadcast %63 : vector<1x256xf32> to vector<8x256xf32>
    %65 = arith.mulf %61, %64 : vector<8x256xf32>
    %c6_43 = arith.constant 6 : index
    %c0_44 = arith.constant 0 : index
    %c0_45 = arith.constant 0 : index
    %66 = vector.load %arg4[%c6_43, %c0_44, %c0_45] : memref<9x8x8xf32, #tpu.memory_space<vmem>>, vector<1x8x8xf32>
    %67 = vector.shape_cast %66 : vector<1x8x8xf32> to vector<8x8xf32>
    %cst_46 = arith.constant dense<0.000000e+00> : vector<8x256xf32>
    %68 = tpu.matmul %67, %65, %cst_46 {dimension_numbers = #tpu.dot_dimension_numbers<[1], [0], [0], [1], [0, 0, 1, 1], [], []>} : vector<8x8xf32>, vector<8x256xf32>, vector<8x256xf32> -> vector<8x256xf32>
    %69 = arith.addf %60, %68 : vector<8x256xf32>
    %c240_i32 = arith.constant 240 : i32
    %70 = tpu.dynamic_rotate %12 by %c240_i32 dim 1 : vector<8x256xf32>, i32 -> vector<8x256xf32>
    %c7 = arith.constant 7 : index
    %c0_47 = arith.constant 0 : index
    %c0_48 = arith.constant 0 : index
    %71 = vector.load %arg5[%c7, %c0_47, %c0_48] : memref<9x1x256xf32, #tpu.memory_space<vmem>>, vector<1x1x256xf32>
    %72 = vector.shape_cast %71 : vector<1x1x256xf32> to vector<1x256xf32>
    %73 = vector.broadcast %72 : vector<1x256xf32> to vector<8x256xf32>
    %74 = arith.mulf %70, %73 : vector<8x256xf32>
    %c7_49 = arith.constant 7 : index
    %c0_50 = arith.constant 0 : index
    %c0_51 = arith.constant 0 : index
    %75 = vector.load %arg4[%c7_49, %c0_50, %c0_51] : memref<9x8x8xf32, #tpu.memory_space<vmem>>, vector<1x8x8xf32>
    %76 = vector.shape_cast %75 : vector<1x8x8xf32> to vector<8x8xf32>
    %cst_52 = arith.constant dense<0.000000e+00> : vector<8x256xf32>
    %77 = tpu.matmul %76, %74, %cst_52 {dimension_numbers = #tpu.dot_dimension_numbers<[1], [0], [0], [1], [0, 0, 1, 1], [], []>} : vector<8x8xf32>, vector<8x256xf32>, vector<8x256xf32> -> vector<8x256xf32>
    %78 = arith.addf %69, %77 : vector<8x256xf32>
    %c239_i32 = arith.constant 239 : i32
    %79 = tpu.dynamic_rotate %12 by %c239_i32 dim 1 : vector<8x256xf32>, i32 -> vector<8x256xf32>
    %c8 = arith.constant 8 : index
    %c0_53 = arith.constant 0 : index
    %c0_54 = arith.constant 0 : index
    %80 = vector.load %arg5[%c8, %c0_53, %c0_54] : memref<9x1x256xf32, #tpu.memory_space<vmem>>, vector<1x1x256xf32>
    %81 = vector.shape_cast %80 : vector<1x1x256xf32> to vector<1x256xf32>
    %82 = vector.broadcast %81 : vector<1x256xf32> to vector<8x256xf32>
    %83 = arith.mulf %79, %82 : vector<8x256xf32>
    %c8_55 = arith.constant 8 : index
    %c0_56 = arith.constant 0 : index
    %c0_57 = arith.constant 0 : index
    %84 = vector.load %arg4[%c8_55, %c0_56, %c0_57] : memref<9x8x8xf32, #tpu.memory_space<vmem>>, vector<1x8x8xf32>
    %85 = vector.shape_cast %84 : vector<1x8x8xf32> to vector<8x8xf32>
    %cst_58 = arith.constant dense<0.000000e+00> : vector<8x256xf32>
    %86 = tpu.matmul %85, %83, %cst_58 {dimension_numbers = #tpu.dot_dimension_numbers<[1], [0], [0], [1], [0, 0, 1, 1], [], []>} : vector<8x8xf32>, vector<8x256xf32>, vector<8x256xf32> -> vector<8x256xf32>
    %87 = arith.addf %78, %86 : vector<8x256xf32>
    %c0_59 = arith.constant 0 : index
    %c0_60 = arith.constant 0 : index
    %c0_61 = arith.constant 0 : index
    %88 = vector.load %arg6[%c0_59, %c0_60, %c0_61] : memref<2x8x256xf32, #tpu.memory_space<vmem>>, vector<1x8x256xf32>
    %89 = vector.shape_cast %88 : vector<1x8x256xf32> to vector<8x256xf32>
    %90 = vector.shape_cast %87 : vector<8x256xf32> to vector<1x8x256xf32>
    tpu.vector_store %arg6[%c0_59, %c0_60, %c0_61], %90 {strides = array<i32>} : memref<2x8x256xf32, #tpu.memory_space<vmem>>, vector<1x8x256xf32>,
    %cst_62 = arith.constant dense<0.000000e+00> : vector<8xf32>
    %91 = vector.multi_reduction <add>, %87, %cst_62 [1] : vector<8x256xf32> to vector<8xf32>
    %92 = vector.shape_cast %91 : vector<8xf32> to vector<8x1xf32>
    %cst_63 = arith.constant 3.906250e-03 : f32
    %93 = vector.broadcast %cst_63 : f32 to vector<8x1xf32>
    %94 = arith.mulf %92, %93 : vector<8x1xf32>
    %95 = vector.broadcast %94 : vector<8x1xf32> to vector<8x256xf32>
    %96 = arith.subf %87, %95 : vector<8x256xf32>
    %97 = arith.mulf %96, %96 : vector<8x256xf32>
    %cst_64 = arith.constant dense<0.000000e+00> : vector<8xf32>
    %98 = vector.multi_reduction <add>, %97, %cst_64 [1] : vector<8x256xf32> to vector<8xf32>
    %99 = vector.shape_cast %98 : vector<8xf32> to vector<8x1xf32>
    %c0_65 = arith.constant 0 : index
    %c0_66 = arith.constant 0 : index
    %c0_67 = arith.constant 0 : index
    %100 = vector.load %arg7[%c0_65, %c0_66, %c0_67] : memref<2x8x2xf32, #tpu.memory_space<vmem>>, vector<1x8x1xf32>
    %101 = vector.shape_cast %100 : vector<1x8x1xf32> to vector<8x1xf32>
    %102 = vector.shape_cast %92 : vector<8x1xf32> to vector<1x8x1xf32>
    tpu.vector_store %arg7[%c0_65, %c0_66, %c0_67], %102 {strides = array<i32>} : memref<2x8x2xf32, #tpu.memory_space<vmem>>, vector<1x8x1xf32>,
    %c0_68 = arith.constant 0 : index
    %c0_69 = arith.constant 0 : index
    %c1_70 = arith.constant 1 : index
    %103 = vector.load %arg7[%c0_68, %c0_69, %c1_70] : memref<2x8x2xf32, #tpu.memory_space<vmem>>, vector<1x8x1xf32>
    %104 = vector.shape_cast %103 : vector<1x8x1xf32> to vector<8x1xf32>
    %105 = vector.shape_cast %99 : vector<8x1xf32> to vector<1x8x1xf32>
    tpu.vector_store %arg7[%c0_68, %c0_69, %c1_70], %105 {strides = array<i32>} : memref<2x8x2xf32, #tpu.memory_space<vmem>>, vector<1x8x1xf32>,
    %c1_71 = arith.constant 1 : index
    %c0_72 = arith.constant 0 : index
    %c0_73 = arith.constant 0 : index
    %106 = vector.load %arg1[%c1_71, %c0_72, %c0_73] : memref<2x8x256xf32, #tpu.memory_space<vmem>>, vector<1x8x256xf32>
    %107 = vector.shape_cast %106 : vector<1x8x256xf32> to vector<8x256xf32>
    %108 = vector.broadcast %0 : vector<8x1xf32> to vector<8x256xf32>
    %109 = arith.mulf %107, %108 : vector<8x256xf32>
    %110 = vector.broadcast %1 : vector<8x1xf32> to vector<8x256xf32>
    %111 = arith.addf %109, %110 : vector<8x256xf32>
    %cst_74 = arith.constant 0.000000e+00 : f32
    %112 = vector.broadcast %cst_74 : f32 to vector<8x256xf32>
    %113 = arith.cmpf ogt, %111, %112 : vector<8x256xf32>
    %cst_75 = arith.constant 1.000000e-01 : f32
    %114 = vector.broadcast %cst_75 : f32 to vector<8x256xf32>
    %115 = arith.mulf %114, %111 : vector<8x256xf32>
    %116 = arith.select %113, %111, %115 : vector<8x256xi1>, vector<8x256xf32>
    %c17_i32_76 = arith.constant 17 : i32
    %117 = tpu.dynamic_rotate %116 by %c17_i32_76 dim 1 : vector<8x256xf32>, i32 -> vector<8x256xf32>
    %c0_77 = arith.constant 0 : index
    %c0_78 = arith.constant 0 : index
    %c0_79 = arith.constant 0 : index
    %118 = vector.load %arg5[%c0_77, %c0_78, %c0_79] : memref<9x1x256xf32, #tpu.memory_space<vmem>>, vector<1x1x256xf32>
    %119 = vector.shape_cast %118 : vector<1x1x256xf32> to vector<1x256xf32>
    %120 = vector.broadcast %119 : vector<1x256xf32> to vector<8x256xf32>
    %121 = arith.mulf %117, %120 : vector<8x256xf32>
    %c0_80 = arith.constant 0 : index
    %c0_81 = arith.constant 0 : index
    %c0_82 = arith.constant 0 : index
    %122 = vector.load %arg4[%c0_80, %c0_81, %c0_82] : memref<9x8x8xf32, #tpu.memory_space<vmem>>, vector<1x8x8xf32>
    %123 = vector.shape_cast %122 : vector<1x8x8xf32> to vector<8x8xf32>
    %cst_83 = arith.constant dense<0.000000e+00> : vector<8x256xf32>
    %124 = tpu.matmul %123, %121, %cst_83 {dimension_numbers = #tpu.dot_dimension_numbers<[1], [0], [0], [1], [0, 0, 1, 1], [], []>} : vector<8x8xf32>, vector<8x256xf32>, vector<8x256xf32> -> vector<8x256xf32>
    %c16_i32_84 = arith.constant 16 : i32
    %125 = tpu.dynamic_rotate %116 by %c16_i32_84 dim 1 : vector<8x256xf32>, i32 -> vector<8x256xf32>
    %c1_85 = arith.constant 1 : index
    %c0_86 = arith.constant 0 : index
    %c0_87 = arith.constant 0 : index
    %126 = vector.load %arg5[%c1_85, %c0_86, %c0_87] : memref<9x1x256xf32, #tpu.memory_space<vmem>>, vector<1x1x256xf32>
    %127 = vector.shape_cast %126 : vector<1x1x256xf32> to vector<1x256xf32>
    %128 = vector.broadcast %127 : vector<1x256xf32> to vector<8x256xf32>
    %129 = arith.mulf %125, %128 : vector<8x256xf32>
    %c1_88 = arith.constant 1 : index
    %c0_89 = arith.constant 0 : index
    %c0_90 = arith.constant 0 : index
    %130 = vector.load %arg4[%c1_88, %c0_89, %c0_90] : memref<9x8x8xf32, #tpu.memory_space<vmem>>, vector<1x8x8xf32>
    %131 = vector.shape_cast %130 : vector<1x8x8xf32> to vector<8x8xf32>
    %cst_91 = arith.constant dense<0.000000e+00> : vector<8x256xf32>
    %132 = tpu.matmul %131, %129, %cst_91 {dimension_numbers = #tpu.dot_dimension_numbers<[1], [0], [0], [1], [0, 0, 1, 1], [], []>} : vector<8x8xf32>, vector<8x256xf32>, vector<8x256xf32> -> vector<8x256xf32>
    %133 = arith.addf %124, %132 : vector<8x256xf32>
    %c15_i32_92 = arith.constant 15 : i32
    %134 = tpu.dynamic_rotate %116 by %c15_i32_92 dim 1 : vector<8x256xf32>, i32 -> vector<8x256xf32>
    %c2_93 = arith.constant 2 : index
    %c0_94 = arith.constant 0 : index
    %c0_95 = arith.constant 0 : index
    %135 = vector.load %arg5[%c2_93, %c0_94, %c0_95] : memref<9x1x256xf32, #tpu.memory_space<vmem>>, vector<1x1x256xf32>
    %136 = vector.shape_cast %135 : vector<1x1x256xf32> to vector<1x256xf32>
    %137 = vector.broadcast %136 : vector<1x256xf32> to vector<8x256xf32>
    %138 = arith.mulf %134, %137 : vector<8x256xf32>
    %c2_96 = arith.constant 2 : index
    %c0_97 = arith.constant 0 : index
    %c0_98 = arith.constant 0 : index
    %139 = vector.load %arg4[%c2_96, %c0_97, %c0_98] : memref<9x8x8xf32, #tpu.memory_space<vmem>>, vector<1x8x8xf32>
    %140 = vector.shape_cast %139 : vector<1x8x8xf32> to vector<8x8xf32>
    %cst_99 = arith.constant dense<0.000000e+00> : vector<8x256xf32>
    %141 = tpu.matmul %140, %138, %cst_99 {dimension_numbers = #tpu.dot_dimension_numbers<[1], [0], [0], [1], [0, 0, 1, 1], [], []>} : vector<8x8xf32>, vector<8x256xf32>, vector<8x256xf32> -> vector<8x256xf32>
    %142 = arith.addf %133, %141 : vector<8x256xf32>
    %c1_i32_100 = arith.constant 1 : i32
    %143 = tpu.dynamic_rotate %116 by %c1_i32_100 dim 1 : vector<8x256xf32>, i32 -> vector<8x256xf32>
    %c3_101 = arith.constant 3 : index
    %c0_102 = arith.constant 0 : index
    %c0_103 = arith.constant 0 : index
    %144 = vector.load %arg5[%c3_101, %c0_102, %c0_103] : memref<9x1x256xf32, #tpu.memory_space<vmem>>, vector<1x1x256xf32>
    %145 = vector.shape_cast %144 : vector<1x1x256xf32> to vector<1x256xf32>
    %146 = vector.broadcast %145 : vector<1x256xf32> to vector<8x256xf32>
    %147 = arith.mulf %143, %146 : vector<8x256xf32>
    %c3_104 = arith.constant 3 : index
    %c0_105 = arith.constant 0 : index
    %c0_106 = arith.constant 0 : index
    %148 = vector.load %arg4[%c3_104, %c0_105, %c0_106] : memref<9x8x8xf32, #tpu.memory_space<vmem>>, vector<1x8x8xf32>
    %149 = vector.shape_cast %148 : vector<1x8x8xf32> to vector<8x8xf32>
    %cst_107 = arith.constant dense<0.000000e+00> : vector<8x256xf32>
    %150 = tpu.matmul %149, %147, %cst_107 {dimension_numbers = #tpu.dot_dimension_numbers<[1], [0], [0], [1], [0, 0, 1, 1], [], []>} : vector<8x8xf32>, vector<8x256xf32>, vector<8x256xf32> -> vector<8x256xf32>
    %151 = arith.addf %142, %150 : vector<8x256xf32>
    %c4_108 = arith.constant 4 : index
    %c0_109 = arith.constant 0 : index
    %c0_110 = arith.constant 0 : index
    %152 = vector.load %arg4[%c4_108, %c0_109, %c0_110] : memref<9x8x8xf32, #tpu.memory_space<vmem>>, vector<1x8x8xf32>
    %153 = vector.shape_cast %152 : vector<1x8x8xf32> to vector<8x8xf32>
    %cst_111 = arith.constant dense<0.000000e+00> : vector<8x256xf32>
    %154 = tpu.matmul %153, %116, %cst_111 {dimension_numbers = #tpu.dot_dimension_numbers<[1], [0], [0], [1], [0, 0, 1, 1], [], []>} : vector<8x8xf32>, vector<8x256xf32>, vector<8x256xf32> -> vector<8x256xf32>
    %155 = arith.addf %151, %154 : vector<8x256xf32>
    %c255_i32_112 = arith.constant 255 : i32
    %156 = tpu.dynamic_rotate %116 by %c255_i32_112 dim 1 : vector<8x256xf32>, i32 -> vector<8x256xf32>
    %c5_113 = arith.constant 5 : index
    %c0_114 = arith.constant 0 : index
    %c0_115 = arith.constant 0 : index
    %157 = vector.load %arg5[%c5_113, %c0_114, %c0_115] : memref<9x1x256xf32, #tpu.memory_space<vmem>>, vector<1x1x256xf32>
    %158 = vector.shape_cast %157 : vector<1x1x256xf32> to vector<1x256xf32>
    %159 = vector.broadcast %158 : vector<1x256xf32> to vector<8x256xf32>
    %160 = arith.mulf %156, %159 : vector<8x256xf32>
    %c5_116 = arith.constant 5 : index
    %c0_117 = arith.constant 0 : index
    %c0_118 = arith.constant 0 : index
    %161 = vector.load %arg4[%c5_116, %c0_117, %c0_118] : memref<9x8x8xf32, #tpu.memory_space<vmem>>, vector<1x8x8xf32>
    %162 = vector.shape_cast %161 : vector<1x8x8xf32> to vector<8x8xf32>
    %cst_119 = arith.constant dense<0.000000e+00> : vector<8x256xf32>
    %163 = tpu.matmul %162, %160, %cst_119 {dimension_numbers = #tpu.dot_dimension_numbers<[1], [0], [0], [1], [0, 0, 1, 1], [], []>} : vector<8x8xf32>, vector<8x256xf32>, vector<8x256xf32> -> vector<8x256xf32>
    %164 = arith.addf %155, %163 : vector<8x256xf32>
    %c241_i32_120 = arith.constant 241 : i32
    %165 = tpu.dynamic_rotate %116 by %c241_i32_120 dim 1 : vector<8x256xf32>, i32 -> vector<8x256xf32>
    %c6_121 = arith.constant 6 : index
    %c0_122 = arith.constant 0 : index
    %c0_123 = arith.constant 0 : index
    %166 = vector.load %arg5[%c6_121, %c0_122, %c0_123] : memref<9x1x256xf32, #tpu.memory_space<vmem>>, vector<1x1x256xf32>
    %167 = vector.shape_cast %166 : vector<1x1x256xf32> to vector<1x256xf32>
    %168 = vector.broadcast %167 : vector<1x256xf32> to vector<8x256xf32>
    %169 = arith.mulf %165, %168 : vector<8x256xf32>
    %c6_124 = arith.constant 6 : index
    %c0_125 = arith.constant 0 : index
    %c0_126 = arith.constant 0 : index
    %170 = vector.load %arg4[%c6_124, %c0_125, %c0_126] : memref<9x8x8xf32, #tpu.memory_space<vmem>>, vector<1x8x8xf32>
    %171 = vector.shape_cast %170 : vector<1x8x8xf32> to vector<8x8xf32>
    %cst_127 = arith.constant dense<0.000000e+00> : vector<8x256xf32>
    %172 = tpu.matmul %171, %169, %cst_127 {dimension_numbers = #tpu.dot_dimension_numbers<[1], [0], [0], [1], [0, 0, 1, 1], [], []>} : vector<8x8xf32>, vector<8x256xf32>, vector<8x256xf32> -> vector<8x256xf32>
    %173 = arith.addf %164, %172 : vector<8x256xf32>
    %c240_i32_128 = arith.constant 240 : i32
    %174 = tpu.dynamic_rotate %116 by %c240_i32_128 dim 1 : vector<8x256xf32>, i32 -> vector<8x256xf32>
    %c7_129 = arith.constant 7 : index
    %c0_130 = arith.constant 0 : index
    %c0_131 = arith.constant 0 : index
    %175 = vector.load %arg5[%c7_129, %c0_130, %c0_131] : memref<9x1x256xf32, #tpu.memory_space<vmem>>, vector<1x1x256xf32>
    %176 = vector.shape_cast %175 : vector<1x1x256xf32> to vector<1x256xf32>
    %177 = vector.broadcast %176 : vector<1x256xf32> to vector<8x256xf32>
    %178 = arith.mulf %174, %177 : vector<8x256xf32>
    %c7_132 = arith.constant 7 : index
    %c0_133 = arith.constant 0 : index
    %c0_134 = arith.constant 0 : index
    %179 = vector.load %arg4[%c7_132, %c0_133, %c0_134] : memref<9x8x8xf32, #tpu.memory_space<vmem>>, vector<1x8x8xf32>
    %180 = vector.shape_cast %179 : vector<1x8x8xf32> to vector<8x8xf32>
    %cst_135 = arith.constant dense<0.000000e+00> : vector<8x256xf32>
    %181 = tpu.matmul %180, %178, %cst_135 {dimension_numbers = #tpu.dot_dimension_numbers<[1], [0], [0], [1], [0, 0, 1, 1], [], []>} : vector<8x8xf32>, vector<8x256xf32>, vector<8x256xf32> -> vector<8x256xf32>
    %182 = arith.addf %173, %181 : vector<8x256xf32>
    %c239_i32_136 = arith.constant 239 : i32
    %183 = tpu.dynamic_rotate %116 by %c239_i32_136 dim 1 : vector<8x256xf32>, i32 -> vector<8x256xf32>
    %c8_137 = arith.constant 8 : index
    %c0_138 = arith.constant 0 : index
    %c0_139 = arith.constant 0 : index
    %184 = vector.load %arg5[%c8_137, %c0_138, %c0_139] : memref<9x1x256xf32, #tpu.memory_space<vmem>>, vector<1x1x256xf32>
    %185 = vector.shape_cast %184 : vector<1x1x256xf32> to vector<1x256xf32>
    %186 = vector.broadcast %185 : vector<1x256xf32> to vector<8x256xf32>
    %187 = arith.mulf %183, %186 : vector<8x256xf32>
    %c8_140 = arith.constant 8 : index
    %c0_141 = arith.constant 0 : index
    %c0_142 = arith.constant 0 : index
    %188 = vector.load %arg4[%c8_140, %c0_141, %c0_142] : memref<9x8x8xf32, #tpu.memory_space<vmem>>, vector<1x8x8xf32>
    %189 = vector.shape_cast %188 : vector<1x8x8xf32> to vector<8x8xf32>
    %cst_143 = arith.constant dense<0.000000e+00> : vector<8x256xf32>
    %190 = tpu.matmul %189, %187, %cst_143 {dimension_numbers = #tpu.dot_dimension_numbers<[1], [0], [0], [1], [0, 0, 1, 1], [], []>} : vector<8x8xf32>, vector<8x256xf32>, vector<8x256xf32> -> vector<8x256xf32>
    %191 = arith.addf %182, %190 : vector<8x256xf32>
    %c1_144 = arith.constant 1 : index
    %c0_145 = arith.constant 0 : index
    %c0_146 = arith.constant 0 : index
    %192 = vector.load %arg6[%c1_144, %c0_145, %c0_146] : memref<2x8x256xf32, #tpu.memory_space<vmem>>, vector<1x8x256xf32>
    %193 = vector.shape_cast %192 : vector<1x8x256xf32> to vector<8x256xf32>
    %194 = vector.shape_cast %191 : vector<8x256xf32> to vector<1x8x256xf32>
    tpu.vector_store %arg6[%c1_144, %c0_145, %c0_146], %194 {strides = array<i32>} : memref<2x8x256xf32, #tpu.memory_space<vmem>>, vector<1x8x256xf32>,
    %cst_147 = arith.constant dense<0.000000e+00> : vector<8xf32>
    %195 = vector.multi_reduction <add>, %191, %cst_147 [1] : vector<8x256xf32> to vector<8xf32>
    %196 = vector.shape_cast %195 : vector<8xf32> to vector<8x1xf32>
    %cst_148 = arith.constant 3.906250e-03 : f32
    %197 = vector.broadcast %cst_148 : f32 to vector<8x1xf32>
    %198 = arith.mulf %196, %197 : vector<8x1xf32>
    %199 = vector.broadcast %198 : vector<8x1xf32> to vector<8x256xf32>
    %200 = arith.subf %191, %199 : vector<8x256xf32>
    %201 = arith.mulf %200, %200 : vector<8x256xf32>
    %cst_149 = arith.constant dense<0.000000e+00> : vector<8xf32>
    %202 = vector.multi_reduction <add>, %201, %cst_149 [1] : vector<8x256xf32> to vector<8xf32>
    %203 = vector.shape_cast %202 : vector<8xf32> to vector<8x1xf32>
    %c1_150 = arith.constant 1 : index
    %c0_151 = arith.constant 0 : index
    %c0_152 = arith.constant 0 : index
    %204 = vector.load %arg7[%c1_150, %c0_151, %c0_152] : memref<2x8x2xf32, #tpu.memory_space<vmem>>, vector<1x8x1xf32>
    %205 = vector.shape_cast %204 : vector<1x8x1xf32> to vector<8x1xf32>
    %206 = vector.shape_cast %196 : vector<8x1xf32> to vector<1x8x1xf32>
    tpu.vector_store %arg7[%c1_150, %c0_151, %c0_152], %206 {strides = array<i32>} : memref<2x8x2xf32, #tpu.memory_space<vmem>>, vector<1x8x1xf32>,
    %c1_153 = arith.constant 1 : index
    %c0_154 = arith.constant 0 : index
    %c1_155 = arith.constant 1 : index
    %207 = vector.load %arg7[%c1_153, %c0_154, %c1_155] : memref<2x8x2xf32, #tpu.memory_space<vmem>>, vector<1x8x1xf32>
    %208 = vector.shape_cast %207 : vector<1x8x1xf32> to vector<8x1xf32>
    %209 = vector.shape_cast %203 : vector<8x1xf32> to vector<1x8x1xf32>
    tpu.vector_store %arg7[%c1_153, %c0_154, %c1_155], %209 {strides = array<i32>} : memref<2x8x2xf32, #tpu.memory_space<vmem>>, vector<1x8x1xf32>,
    return
  }
  func.func @transform_0(%arg0: i32) -> (i32, i32, i32) {
    %c0_i32 = arith.constant 0 : i32
    %c0_i32_0 = arith.constant 0 : i32
    %c0_i32_1 = arith.constant 0 : i32
    return %arg0, %c0_i32, %c0_i32_0 : i32, i32, i32
  }
  func.func @transform_1(%arg0: i32) -> (i32, i32) {
    %c0_i32 = arith.constant 0 : i32
    %c0_i32_0 = arith.constant 0 : i32
    %c0_i32_1 = arith.constant 0 : i32
    return %c0_i32, %c0_i32_0 : i32, i32
  }
  func.func @transform_2(%arg0: i32) -> (i32, i32) {
    %c0_i32 = arith.constant 0 : i32
    %c0_i32_0 = arith.constant 0 : i32
    %c0_i32_1 = arith.constant 0 : i32
    return %c0_i32, %c0_i32_0 : i32, i32
  }
  func.func @transform_3(%arg0: i32) -> (i32, i32, i32) {
    %c0_i32 = arith.constant 0 : i32
    %c0_i32_0 = arith.constant 0 : i32
    %c0_i32_1 = arith.constant 0 : i32
    %c0_i32_2 = arith.constant 0 : i32
    return %c0_i32, %c0_i32_0, %c0_i32_1 : i32, i32, i32
  }
  func.func @transform_4(%arg0: i32) -> (i32, i32, i32) {
    %c0_i32 = arith.constant 0 : i32
    %c0_i32_0 = arith.constant 0 : i32
    %c0_i32_1 = arith.constant 0 : i32
    %c0_i32_2 = arith.constant 0 : i32
    return %c0_i32, %c0_i32_0, %c0_i32_1 : i32, i32, i32
  }
  func.func @transform_5(%arg0: i32) -> (i32, i32, i32) {
    %c0_i32 = arith.constant 0 : i32
    %c0_i32_0 = arith.constant 0 : i32
    %c0_i32_1 = arith.constant 0 : i32
    return %arg0, %c0_i32, %c0_i32_0 : i32, i32, i32
  }
  func.func @transform_6(%arg0: i32) -> (i32, i32, i32) {
    %c0_i32 = arith.constant 0 : i32
    %c0_i32_0 = arith.constant 0 : i32
    %c0_i32_1 = arith.constant 0 : i32
    return %arg0, %c0_i32, %c0_i32_0 : i32, i32, i32
  }
}

module attributes {stable_mosaic.version = 11 : i64} {
  func.func @_conv_stats_kernel(%arg0: i32, %arg1: memref<2x8x256xf32, #tpu.memory_space<vmem>>, %arg2: memref<9x8x8xf32, #tpu.memory_space<vmem>>, %arg3: memref<9x1x256xf32, #tpu.memory_space<vmem>>, %arg4: memref<2x8x256xf32, #tpu.memory_space<vmem>>, %arg5: memref<2x8x2xf32, #tpu.memory_space<vmem>>) attributes {dimension_semantics = [#tpu.dimension_semantics<parallel>], iteration_bounds = array<i64: 1>, scalar_prefetch = 0 : i64, scratch_operands = 0 : i64, tpu.core_type = #tpu.core_type<tc>, window_params = [{transform_indices = @transform_0, window_bounds = array<i64: 2, 8, 256>}, {pipeline_mode = #tpu.pipeline_mode<synchronous>, transform_indices = @transform_1, window_bounds = array<i64: 9, 8, 8>}, {pipeline_mode = #tpu.pipeline_mode<synchronous>, transform_indices = @transform_2, window_bounds = array<i64: 9, 1, 256>}, {transform_indices = @transform_3, window_bounds = array<i64: 2, 8, 256>}, {transform_indices = @transform_4, window_bounds = array<i64: 2, 8, 2>}]} {
    %c0 = arith.constant 0 : index
    %c0_0 = arith.constant 0 : index
    %c0_1 = arith.constant 0 : index
    %0 = vector.load %arg1[%c0, %c0_0, %c0_1] : memref<2x8x256xf32, #tpu.memory_space<vmem>>, vector<1x8x256xf32>
    %1 = vector.shape_cast %0 : vector<1x8x256xf32> to vector<8x256xf32>
    %c17_i32 = arith.constant 17 : i32
    %2 = tpu.dynamic_rotate %1 by %c17_i32 dim 1 : vector<8x256xf32>, i32 -> vector<8x256xf32>
    %c0_2 = arith.constant 0 : index
    %c0_3 = arith.constant 0 : index
    %c0_4 = arith.constant 0 : index
    %3 = vector.load %arg3[%c0_2, %c0_3, %c0_4] : memref<9x1x256xf32, #tpu.memory_space<vmem>>, vector<1x1x256xf32>
    %4 = vector.shape_cast %3 : vector<1x1x256xf32> to vector<1x256xf32>
    %5 = vector.broadcast %4 : vector<1x256xf32> to vector<8x256xf32>
    %6 = arith.mulf %2, %5 : vector<8x256xf32>
    %c0_5 = arith.constant 0 : index
    %c0_6 = arith.constant 0 : index
    %c0_7 = arith.constant 0 : index
    %7 = vector.load %arg2[%c0_5, %c0_6, %c0_7] : memref<9x8x8xf32, #tpu.memory_space<vmem>>, vector<1x8x8xf32>
    %8 = vector.shape_cast %7 : vector<1x8x8xf32> to vector<8x8xf32>
    %cst = arith.constant dense<0.000000e+00> : vector<8x256xf32>
    %9 = tpu.matmul %8, %6, %cst {dimension_numbers = #tpu.dot_dimension_numbers<[1], [0], [0], [1], [0, 0, 1, 1], [], []>} : vector<8x8xf32>, vector<8x256xf32>, vector<8x256xf32> -> vector<8x256xf32>
    %c16_i32 = arith.constant 16 : i32
    %10 = tpu.dynamic_rotate %1 by %c16_i32 dim 1 : vector<8x256xf32>, i32 -> vector<8x256xf32>
    %c1 = arith.constant 1 : index
    %c0_8 = arith.constant 0 : index
    %c0_9 = arith.constant 0 : index
    %11 = vector.load %arg3[%c1, %c0_8, %c0_9] : memref<9x1x256xf32, #tpu.memory_space<vmem>>, vector<1x1x256xf32>
    %12 = vector.shape_cast %11 : vector<1x1x256xf32> to vector<1x256xf32>
    %13 = vector.broadcast %12 : vector<1x256xf32> to vector<8x256xf32>
    %14 = arith.mulf %10, %13 : vector<8x256xf32>
    %c1_10 = arith.constant 1 : index
    %c0_11 = arith.constant 0 : index
    %c0_12 = arith.constant 0 : index
    %15 = vector.load %arg2[%c1_10, %c0_11, %c0_12] : memref<9x8x8xf32, #tpu.memory_space<vmem>>, vector<1x8x8xf32>
    %16 = vector.shape_cast %15 : vector<1x8x8xf32> to vector<8x8xf32>
    %cst_13 = arith.constant dense<0.000000e+00> : vector<8x256xf32>
    %17 = tpu.matmul %16, %14, %cst_13 {dimension_numbers = #tpu.dot_dimension_numbers<[1], [0], [0], [1], [0, 0, 1, 1], [], []>} : vector<8x8xf32>, vector<8x256xf32>, vector<8x256xf32> -> vector<8x256xf32>
    %18 = arith.addf %9, %17 : vector<8x256xf32>
    %c15_i32 = arith.constant 15 : i32
    %19 = tpu.dynamic_rotate %1 by %c15_i32 dim 1 : vector<8x256xf32>, i32 -> vector<8x256xf32>
    %c2 = arith.constant 2 : index
    %c0_14 = arith.constant 0 : index
    %c0_15 = arith.constant 0 : index
    %20 = vector.load %arg3[%c2, %c0_14, %c0_15] : memref<9x1x256xf32, #tpu.memory_space<vmem>>, vector<1x1x256xf32>
    %21 = vector.shape_cast %20 : vector<1x1x256xf32> to vector<1x256xf32>
    %22 = vector.broadcast %21 : vector<1x256xf32> to vector<8x256xf32>
    %23 = arith.mulf %19, %22 : vector<8x256xf32>
    %c2_16 = arith.constant 2 : index
    %c0_17 = arith.constant 0 : index
    %c0_18 = arith.constant 0 : index
    %24 = vector.load %arg2[%c2_16, %c0_17, %c0_18] : memref<9x8x8xf32, #tpu.memory_space<vmem>>, vector<1x8x8xf32>
    %25 = vector.shape_cast %24 : vector<1x8x8xf32> to vector<8x8xf32>
    %cst_19 = arith.constant dense<0.000000e+00> : vector<8x256xf32>
    %26 = tpu.matmul %25, %23, %cst_19 {dimension_numbers = #tpu.dot_dimension_numbers<[1], [0], [0], [1], [0, 0, 1, 1], [], []>} : vector<8x8xf32>, vector<8x256xf32>, vector<8x256xf32> -> vector<8x256xf32>
    %27 = arith.addf %18, %26 : vector<8x256xf32>
    %c1_i32 = arith.constant 1 : i32
    %28 = tpu.dynamic_rotate %1 by %c1_i32 dim 1 : vector<8x256xf32>, i32 -> vector<8x256xf32>
    %c3 = arith.constant 3 : index
    %c0_20 = arith.constant 0 : index
    %c0_21 = arith.constant 0 : index
    %29 = vector.load %arg3[%c3, %c0_20, %c0_21] : memref<9x1x256xf32, #tpu.memory_space<vmem>>, vector<1x1x256xf32>
    %30 = vector.shape_cast %29 : vector<1x1x256xf32> to vector<1x256xf32>
    %31 = vector.broadcast %30 : vector<1x256xf32> to vector<8x256xf32>
    %32 = arith.mulf %28, %31 : vector<8x256xf32>
    %c3_22 = arith.constant 3 : index
    %c0_23 = arith.constant 0 : index
    %c0_24 = arith.constant 0 : index
    %33 = vector.load %arg2[%c3_22, %c0_23, %c0_24] : memref<9x8x8xf32, #tpu.memory_space<vmem>>, vector<1x8x8xf32>
    %34 = vector.shape_cast %33 : vector<1x8x8xf32> to vector<8x8xf32>
    %cst_25 = arith.constant dense<0.000000e+00> : vector<8x256xf32>
    %35 = tpu.matmul %34, %32, %cst_25 {dimension_numbers = #tpu.dot_dimension_numbers<[1], [0], [0], [1], [0, 0, 1, 1], [], []>} : vector<8x8xf32>, vector<8x256xf32>, vector<8x256xf32> -> vector<8x256xf32>
    %36 = arith.addf %27, %35 : vector<8x256xf32>
    %c4 = arith.constant 4 : index
    %c0_26 = arith.constant 0 : index
    %c0_27 = arith.constant 0 : index
    %37 = vector.load %arg2[%c4, %c0_26, %c0_27] : memref<9x8x8xf32, #tpu.memory_space<vmem>>, vector<1x8x8xf32>
    %38 = vector.shape_cast %37 : vector<1x8x8xf32> to vector<8x8xf32>
    %cst_28 = arith.constant dense<0.000000e+00> : vector<8x256xf32>
    %39 = tpu.matmul %38, %1, %cst_28 {dimension_numbers = #tpu.dot_dimension_numbers<[1], [0], [0], [1], [0, 0, 1, 1], [], []>} : vector<8x8xf32>, vector<8x256xf32>, vector<8x256xf32> -> vector<8x256xf32>
    %40 = arith.addf %36, %39 : vector<8x256xf32>
    %c255_i32 = arith.constant 255 : i32
    %41 = tpu.dynamic_rotate %1 by %c255_i32 dim 1 : vector<8x256xf32>, i32 -> vector<8x256xf32>
    %c5 = arith.constant 5 : index
    %c0_29 = arith.constant 0 : index
    %c0_30 = arith.constant 0 : index
    %42 = vector.load %arg3[%c5, %c0_29, %c0_30] : memref<9x1x256xf32, #tpu.memory_space<vmem>>, vector<1x1x256xf32>
    %43 = vector.shape_cast %42 : vector<1x1x256xf32> to vector<1x256xf32>
    %44 = vector.broadcast %43 : vector<1x256xf32> to vector<8x256xf32>
    %45 = arith.mulf %41, %44 : vector<8x256xf32>
    %c5_31 = arith.constant 5 : index
    %c0_32 = arith.constant 0 : index
    %c0_33 = arith.constant 0 : index
    %46 = vector.load %arg2[%c5_31, %c0_32, %c0_33] : memref<9x8x8xf32, #tpu.memory_space<vmem>>, vector<1x8x8xf32>
    %47 = vector.shape_cast %46 : vector<1x8x8xf32> to vector<8x8xf32>
    %cst_34 = arith.constant dense<0.000000e+00> : vector<8x256xf32>
    %48 = tpu.matmul %47, %45, %cst_34 {dimension_numbers = #tpu.dot_dimension_numbers<[1], [0], [0], [1], [0, 0, 1, 1], [], []>} : vector<8x8xf32>, vector<8x256xf32>, vector<8x256xf32> -> vector<8x256xf32>
    %49 = arith.addf %40, %48 : vector<8x256xf32>
    %c241_i32 = arith.constant 241 : i32
    %50 = tpu.dynamic_rotate %1 by %c241_i32 dim 1 : vector<8x256xf32>, i32 -> vector<8x256xf32>
    %c6 = arith.constant 6 : index
    %c0_35 = arith.constant 0 : index
    %c0_36 = arith.constant 0 : index
    %51 = vector.load %arg3[%c6, %c0_35, %c0_36] : memref<9x1x256xf32, #tpu.memory_space<vmem>>, vector<1x1x256xf32>
    %52 = vector.shape_cast %51 : vector<1x1x256xf32> to vector<1x256xf32>
    %53 = vector.broadcast %52 : vector<1x256xf32> to vector<8x256xf32>
    %54 = arith.mulf %50, %53 : vector<8x256xf32>
    %c6_37 = arith.constant 6 : index
    %c0_38 = arith.constant 0 : index
    %c0_39 = arith.constant 0 : index
    %55 = vector.load %arg2[%c6_37, %c0_38, %c0_39] : memref<9x8x8xf32, #tpu.memory_space<vmem>>, vector<1x8x8xf32>
    %56 = vector.shape_cast %55 : vector<1x8x8xf32> to vector<8x8xf32>
    %cst_40 = arith.constant dense<0.000000e+00> : vector<8x256xf32>
    %57 = tpu.matmul %56, %54, %cst_40 {dimension_numbers = #tpu.dot_dimension_numbers<[1], [0], [0], [1], [0, 0, 1, 1], [], []>} : vector<8x8xf32>, vector<8x256xf32>, vector<8x256xf32> -> vector<8x256xf32>
    %58 = arith.addf %49, %57 : vector<8x256xf32>
    %c240_i32 = arith.constant 240 : i32
    %59 = tpu.dynamic_rotate %1 by %c240_i32 dim 1 : vector<8x256xf32>, i32 -> vector<8x256xf32>
    %c7 = arith.constant 7 : index
    %c0_41 = arith.constant 0 : index
    %c0_42 = arith.constant 0 : index
    %60 = vector.load %arg3[%c7, %c0_41, %c0_42] : memref<9x1x256xf32, #tpu.memory_space<vmem>>, vector<1x1x256xf32>
    %61 = vector.shape_cast %60 : vector<1x1x256xf32> to vector<1x256xf32>
    %62 = vector.broadcast %61 : vector<1x256xf32> to vector<8x256xf32>
    %63 = arith.mulf %59, %62 : vector<8x256xf32>
    %c7_43 = arith.constant 7 : index
    %c0_44 = arith.constant 0 : index
    %c0_45 = arith.constant 0 : index
    %64 = vector.load %arg2[%c7_43, %c0_44, %c0_45] : memref<9x8x8xf32, #tpu.memory_space<vmem>>, vector<1x8x8xf32>
    %65 = vector.shape_cast %64 : vector<1x8x8xf32> to vector<8x8xf32>
    %cst_46 = arith.constant dense<0.000000e+00> : vector<8x256xf32>
    %66 = tpu.matmul %65, %63, %cst_46 {dimension_numbers = #tpu.dot_dimension_numbers<[1], [0], [0], [1], [0, 0, 1, 1], [], []>} : vector<8x8xf32>, vector<8x256xf32>, vector<8x256xf32> -> vector<8x256xf32>
    %67 = arith.addf %58, %66 : vector<8x256xf32>
    %c239_i32 = arith.constant 239 : i32
    %68 = tpu.dynamic_rotate %1 by %c239_i32 dim 1 : vector<8x256xf32>, i32 -> vector<8x256xf32>
    %c8 = arith.constant 8 : index
    %c0_47 = arith.constant 0 : index
    %c0_48 = arith.constant 0 : index
    %69 = vector.load %arg3[%c8, %c0_47, %c0_48] : memref<9x1x256xf32, #tpu.memory_space<vmem>>, vector<1x1x256xf32>
    %70 = vector.shape_cast %69 : vector<1x1x256xf32> to vector<1x256xf32>
    %71 = vector.broadcast %70 : vector<1x256xf32> to vector<8x256xf32>
    %72 = arith.mulf %68, %71 : vector<8x256xf32>
    %c8_49 = arith.constant 8 : index
    %c0_50 = arith.constant 0 : index
    %c0_51 = arith.constant 0 : index
    %73 = vector.load %arg2[%c8_49, %c0_50, %c0_51] : memref<9x8x8xf32, #tpu.memory_space<vmem>>, vector<1x8x8xf32>
    %74 = vector.shape_cast %73 : vector<1x8x8xf32> to vector<8x8xf32>
    %cst_52 = arith.constant dense<0.000000e+00> : vector<8x256xf32>
    %75 = tpu.matmul %74, %72, %cst_52 {dimension_numbers = #tpu.dot_dimension_numbers<[1], [0], [0], [1], [0, 0, 1, 1], [], []>} : vector<8x8xf32>, vector<8x256xf32>, vector<8x256xf32> -> vector<8x256xf32>
    %76 = arith.addf %67, %75 : vector<8x256xf32>
    %c0_53 = arith.constant 0 : index
    %c0_54 = arith.constant 0 : index
    %c0_55 = arith.constant 0 : index
    %77 = vector.load %arg4[%c0_53, %c0_54, %c0_55] : memref<2x8x256xf32, #tpu.memory_space<vmem>>, vector<1x8x256xf32>
    %78 = vector.shape_cast %77 : vector<1x8x256xf32> to vector<8x256xf32>
    %79 = vector.shape_cast %76 : vector<8x256xf32> to vector<1x8x256xf32>
    tpu.vector_store %arg4[%c0_53, %c0_54, %c0_55], %79 {strides = array<i32>} : memref<2x8x256xf32, #tpu.memory_space<vmem>>, vector<1x8x256xf32>,
    %cst_56 = arith.constant dense<0.000000e+00> : vector<8xf32>
    %80 = vector.multi_reduction <add>, %76, %cst_56 [1] : vector<8x256xf32> to vector<8xf32>
    %81 = vector.shape_cast %80 : vector<8xf32> to vector<8x1xf32>
    %cst_57 = arith.constant 3.906250e-03 : f32
    %82 = vector.broadcast %cst_57 : f32 to vector<8x1xf32>
    %83 = arith.mulf %81, %82 : vector<8x1xf32>
    %84 = vector.broadcast %83 : vector<8x1xf32> to vector<8x256xf32>
    %85 = arith.subf %76, %84 : vector<8x256xf32>
    %86 = arith.mulf %85, %85 : vector<8x256xf32>
    %cst_58 = arith.constant dense<0.000000e+00> : vector<8xf32>
    %87 = vector.multi_reduction <add>, %86, %cst_58 [1] : vector<8x256xf32> to vector<8xf32>
    %88 = vector.shape_cast %87 : vector<8xf32> to vector<8x1xf32>
    %c0_59 = arith.constant 0 : index
    %c0_60 = arith.constant 0 : index
    %c0_61 = arith.constant 0 : index
    %89 = vector.load %arg5[%c0_59, %c0_60, %c0_61] : memref<2x8x2xf32, #tpu.memory_space<vmem>>, vector<1x8x1xf32>
    %90 = vector.shape_cast %89 : vector<1x8x1xf32> to vector<8x1xf32>
    %91 = vector.shape_cast %81 : vector<8x1xf32> to vector<1x8x1xf32>
    tpu.vector_store %arg5[%c0_59, %c0_60, %c0_61], %91 {strides = array<i32>} : memref<2x8x2xf32, #tpu.memory_space<vmem>>, vector<1x8x1xf32>,
    %c0_62 = arith.constant 0 : index
    %c0_63 = arith.constant 0 : index
    %c1_64 = arith.constant 1 : index
    %92 = vector.load %arg5[%c0_62, %c0_63, %c1_64] : memref<2x8x2xf32, #tpu.memory_space<vmem>>, vector<1x8x1xf32>
    %93 = vector.shape_cast %92 : vector<1x8x1xf32> to vector<8x1xf32>
    %94 = vector.shape_cast %88 : vector<8x1xf32> to vector<1x8x1xf32>
    tpu.vector_store %arg5[%c0_62, %c0_63, %c1_64], %94 {strides = array<i32>} : memref<2x8x2xf32, #tpu.memory_space<vmem>>, vector<1x8x1xf32>,
    %c1_65 = arith.constant 1 : index
    %c0_66 = arith.constant 0 : index
    %c0_67 = arith.constant 0 : index
    %95 = vector.load %arg1[%c1_65, %c0_66, %c0_67] : memref<2x8x256xf32, #tpu.memory_space<vmem>>, vector<1x8x256xf32>
    %96 = vector.shape_cast %95 : vector<1x8x256xf32> to vector<8x256xf32>
    %c17_i32_68 = arith.constant 17 : i32
    %97 = tpu.dynamic_rotate %96 by %c17_i32_68 dim 1 : vector<8x256xf32>, i32 -> vector<8x256xf32>
    %c0_69 = arith.constant 0 : index
    %c0_70 = arith.constant 0 : index
    %c0_71 = arith.constant 0 : index
    %98 = vector.load %arg3[%c0_69, %c0_70, %c0_71] : memref<9x1x256xf32, #tpu.memory_space<vmem>>, vector<1x1x256xf32>
    %99 = vector.shape_cast %98 : vector<1x1x256xf32> to vector<1x256xf32>
    %100 = vector.broadcast %99 : vector<1x256xf32> to vector<8x256xf32>
    %101 = arith.mulf %97, %100 : vector<8x256xf32>
    %c0_72 = arith.constant 0 : index
    %c0_73 = arith.constant 0 : index
    %c0_74 = arith.constant 0 : index
    %102 = vector.load %arg2[%c0_72, %c0_73, %c0_74] : memref<9x8x8xf32, #tpu.memory_space<vmem>>, vector<1x8x8xf32>
    %103 = vector.shape_cast %102 : vector<1x8x8xf32> to vector<8x8xf32>
    %cst_75 = arith.constant dense<0.000000e+00> : vector<8x256xf32>
    %104 = tpu.matmul %103, %101, %cst_75 {dimension_numbers = #tpu.dot_dimension_numbers<[1], [0], [0], [1], [0, 0, 1, 1], [], []>} : vector<8x8xf32>, vector<8x256xf32>, vector<8x256xf32> -> vector<8x256xf32>
    %c16_i32_76 = arith.constant 16 : i32
    %105 = tpu.dynamic_rotate %96 by %c16_i32_76 dim 1 : vector<8x256xf32>, i32 -> vector<8x256xf32>
    %c1_77 = arith.constant 1 : index
    %c0_78 = arith.constant 0 : index
    %c0_79 = arith.constant 0 : index
    %106 = vector.load %arg3[%c1_77, %c0_78, %c0_79] : memref<9x1x256xf32, #tpu.memory_space<vmem>>, vector<1x1x256xf32>
    %107 = vector.shape_cast %106 : vector<1x1x256xf32> to vector<1x256xf32>
    %108 = vector.broadcast %107 : vector<1x256xf32> to vector<8x256xf32>
    %109 = arith.mulf %105, %108 : vector<8x256xf32>
    %c1_80 = arith.constant 1 : index
    %c0_81 = arith.constant 0 : index
    %c0_82 = arith.constant 0 : index
    %110 = vector.load %arg2[%c1_80, %c0_81, %c0_82] : memref<9x8x8xf32, #tpu.memory_space<vmem>>, vector<1x8x8xf32>
    %111 = vector.shape_cast %110 : vector<1x8x8xf32> to vector<8x8xf32>
    %cst_83 = arith.constant dense<0.000000e+00> : vector<8x256xf32>
    %112 = tpu.matmul %111, %109, %cst_83 {dimension_numbers = #tpu.dot_dimension_numbers<[1], [0], [0], [1], [0, 0, 1, 1], [], []>} : vector<8x8xf32>, vector<8x256xf32>, vector<8x256xf32> -> vector<8x256xf32>
    %113 = arith.addf %104, %112 : vector<8x256xf32>
    %c15_i32_84 = arith.constant 15 : i32
    %114 = tpu.dynamic_rotate %96 by %c15_i32_84 dim 1 : vector<8x256xf32>, i32 -> vector<8x256xf32>
    %c2_85 = arith.constant 2 : index
    %c0_86 = arith.constant 0 : index
    %c0_87 = arith.constant 0 : index
    %115 = vector.load %arg3[%c2_85, %c0_86, %c0_87] : memref<9x1x256xf32, #tpu.memory_space<vmem>>, vector<1x1x256xf32>
    %116 = vector.shape_cast %115 : vector<1x1x256xf32> to vector<1x256xf32>
    %117 = vector.broadcast %116 : vector<1x256xf32> to vector<8x256xf32>
    %118 = arith.mulf %114, %117 : vector<8x256xf32>
    %c2_88 = arith.constant 2 : index
    %c0_89 = arith.constant 0 : index
    %c0_90 = arith.constant 0 : index
    %119 = vector.load %arg2[%c2_88, %c0_89, %c0_90] : memref<9x8x8xf32, #tpu.memory_space<vmem>>, vector<1x8x8xf32>
    %120 = vector.shape_cast %119 : vector<1x8x8xf32> to vector<8x8xf32>
    %cst_91 = arith.constant dense<0.000000e+00> : vector<8x256xf32>
    %121 = tpu.matmul %120, %118, %cst_91 {dimension_numbers = #tpu.dot_dimension_numbers<[1], [0], [0], [1], [0, 0, 1, 1], [], []>} : vector<8x8xf32>, vector<8x256xf32>, vector<8x256xf32> -> vector<8x256xf32>
    %122 = arith.addf %113, %121 : vector<8x256xf32>
    %c1_i32_92 = arith.constant 1 : i32
    %123 = tpu.dynamic_rotate %96 by %c1_i32_92 dim 1 : vector<8x256xf32>, i32 -> vector<8x256xf32>
    %c3_93 = arith.constant 3 : index
    %c0_94 = arith.constant 0 : index
    %c0_95 = arith.constant 0 : index
    %124 = vector.load %arg3[%c3_93, %c0_94, %c0_95] : memref<9x1x256xf32, #tpu.memory_space<vmem>>, vector<1x1x256xf32>
    %125 = vector.shape_cast %124 : vector<1x1x256xf32> to vector<1x256xf32>
    %126 = vector.broadcast %125 : vector<1x256xf32> to vector<8x256xf32>
    %127 = arith.mulf %123, %126 : vector<8x256xf32>
    %c3_96 = arith.constant 3 : index
    %c0_97 = arith.constant 0 : index
    %c0_98 = arith.constant 0 : index
    %128 = vector.load %arg2[%c3_96, %c0_97, %c0_98] : memref<9x8x8xf32, #tpu.memory_space<vmem>>, vector<1x8x8xf32>
    %129 = vector.shape_cast %128 : vector<1x8x8xf32> to vector<8x8xf32>
    %cst_99 = arith.constant dense<0.000000e+00> : vector<8x256xf32>
    %130 = tpu.matmul %129, %127, %cst_99 {dimension_numbers = #tpu.dot_dimension_numbers<[1], [0], [0], [1], [0, 0, 1, 1], [], []>} : vector<8x8xf32>, vector<8x256xf32>, vector<8x256xf32> -> vector<8x256xf32>
    %131 = arith.addf %122, %130 : vector<8x256xf32>
    %c4_100 = arith.constant 4 : index
    %c0_101 = arith.constant 0 : index
    %c0_102 = arith.constant 0 : index
    %132 = vector.load %arg2[%c4_100, %c0_101, %c0_102] : memref<9x8x8xf32, #tpu.memory_space<vmem>>, vector<1x8x8xf32>
    %133 = vector.shape_cast %132 : vector<1x8x8xf32> to vector<8x8xf32>
    %cst_103 = arith.constant dense<0.000000e+00> : vector<8x256xf32>
    %134 = tpu.matmul %133, %96, %cst_103 {dimension_numbers = #tpu.dot_dimension_numbers<[1], [0], [0], [1], [0, 0, 1, 1], [], []>} : vector<8x8xf32>, vector<8x256xf32>, vector<8x256xf32> -> vector<8x256xf32>
    %135 = arith.addf %131, %134 : vector<8x256xf32>
    %c255_i32_104 = arith.constant 255 : i32
    %136 = tpu.dynamic_rotate %96 by %c255_i32_104 dim 1 : vector<8x256xf32>, i32 -> vector<8x256xf32>
    %c5_105 = arith.constant 5 : index
    %c0_106 = arith.constant 0 : index
    %c0_107 = arith.constant 0 : index
    %137 = vector.load %arg3[%c5_105, %c0_106, %c0_107] : memref<9x1x256xf32, #tpu.memory_space<vmem>>, vector<1x1x256xf32>
    %138 = vector.shape_cast %137 : vector<1x1x256xf32> to vector<1x256xf32>
    %139 = vector.broadcast %138 : vector<1x256xf32> to vector<8x256xf32>
    %140 = arith.mulf %136, %139 : vector<8x256xf32>
    %c5_108 = arith.constant 5 : index
    %c0_109 = arith.constant 0 : index
    %c0_110 = arith.constant 0 : index
    %141 = vector.load %arg2[%c5_108, %c0_109, %c0_110] : memref<9x8x8xf32, #tpu.memory_space<vmem>>, vector<1x8x8xf32>
    %142 = vector.shape_cast %141 : vector<1x8x8xf32> to vector<8x8xf32>
    %cst_111 = arith.constant dense<0.000000e+00> : vector<8x256xf32>
    %143 = tpu.matmul %142, %140, %cst_111 {dimension_numbers = #tpu.dot_dimension_numbers<[1], [0], [0], [1], [0, 0, 1, 1], [], []>} : vector<8x8xf32>, vector<8x256xf32>, vector<8x256xf32> -> vector<8x256xf32>
    %144 = arith.addf %135, %143 : vector<8x256xf32>
    %c241_i32_112 = arith.constant 241 : i32
    %145 = tpu.dynamic_rotate %96 by %c241_i32_112 dim 1 : vector<8x256xf32>, i32 -> vector<8x256xf32>
    %c6_113 = arith.constant 6 : index
    %c0_114 = arith.constant 0 : index
    %c0_115 = arith.constant 0 : index
    %146 = vector.load %arg3[%c6_113, %c0_114, %c0_115] : memref<9x1x256xf32, #tpu.memory_space<vmem>>, vector<1x1x256xf32>
    %147 = vector.shape_cast %146 : vector<1x1x256xf32> to vector<1x256xf32>
    %148 = vector.broadcast %147 : vector<1x256xf32> to vector<8x256xf32>
    %149 = arith.mulf %145, %148 : vector<8x256xf32>
    %c6_116 = arith.constant 6 : index
    %c0_117 = arith.constant 0 : index
    %c0_118 = arith.constant 0 : index
    %150 = vector.load %arg2[%c6_116, %c0_117, %c0_118] : memref<9x8x8xf32, #tpu.memory_space<vmem>>, vector<1x8x8xf32>
    %151 = vector.shape_cast %150 : vector<1x8x8xf32> to vector<8x8xf32>
    %cst_119 = arith.constant dense<0.000000e+00> : vector<8x256xf32>
    %152 = tpu.matmul %151, %149, %cst_119 {dimension_numbers = #tpu.dot_dimension_numbers<[1], [0], [0], [1], [0, 0, 1, 1], [], []>} : vector<8x8xf32>, vector<8x256xf32>, vector<8x256xf32> -> vector<8x256xf32>
    %153 = arith.addf %144, %152 : vector<8x256xf32>
    %c240_i32_120 = arith.constant 240 : i32
    %154 = tpu.dynamic_rotate %96 by %c240_i32_120 dim 1 : vector<8x256xf32>, i32 -> vector<8x256xf32>
    %c7_121 = arith.constant 7 : index
    %c0_122 = arith.constant 0 : index
    %c0_123 = arith.constant 0 : index
    %155 = vector.load %arg3[%c7_121, %c0_122, %c0_123] : memref<9x1x256xf32, #tpu.memory_space<vmem>>, vector<1x1x256xf32>
    %156 = vector.shape_cast %155 : vector<1x1x256xf32> to vector<1x256xf32>
    %157 = vector.broadcast %156 : vector<1x256xf32> to vector<8x256xf32>
    %158 = arith.mulf %154, %157 : vector<8x256xf32>
    %c7_124 = arith.constant 7 : index
    %c0_125 = arith.constant 0 : index
    %c0_126 = arith.constant 0 : index
    %159 = vector.load %arg2[%c7_124, %c0_125, %c0_126] : memref<9x8x8xf32, #tpu.memory_space<vmem>>, vector<1x8x8xf32>
    %160 = vector.shape_cast %159 : vector<1x8x8xf32> to vector<8x8xf32>
    %cst_127 = arith.constant dense<0.000000e+00> : vector<8x256xf32>
    %161 = tpu.matmul %160, %158, %cst_127 {dimension_numbers = #tpu.dot_dimension_numbers<[1], [0], [0], [1], [0, 0, 1, 1], [], []>} : vector<8x8xf32>, vector<8x256xf32>, vector<8x256xf32> -> vector<8x256xf32>
    %162 = arith.addf %153, %161 : vector<8x256xf32>
    %c239_i32_128 = arith.constant 239 : i32
    %163 = tpu.dynamic_rotate %96 by %c239_i32_128 dim 1 : vector<8x256xf32>, i32 -> vector<8x256xf32>
    %c8_129 = arith.constant 8 : index
    %c0_130 = arith.constant 0 : index
    %c0_131 = arith.constant 0 : index
    %164 = vector.load %arg3[%c8_129, %c0_130, %c0_131] : memref<9x1x256xf32, #tpu.memory_space<vmem>>, vector<1x1x256xf32>
    %165 = vector.shape_cast %164 : vector<1x1x256xf32> to vector<1x256xf32>
    %166 = vector.broadcast %165 : vector<1x256xf32> to vector<8x256xf32>
    %167 = arith.mulf %163, %166 : vector<8x256xf32>
    %c8_132 = arith.constant 8 : index
    %c0_133 = arith.constant 0 : index
    %c0_134 = arith.constant 0 : index
    %168 = vector.load %arg2[%c8_132, %c0_133, %c0_134] : memref<9x8x8xf32, #tpu.memory_space<vmem>>, vector<1x8x8xf32>
    %169 = vector.shape_cast %168 : vector<1x8x8xf32> to vector<8x8xf32>
    %cst_135 = arith.constant dense<0.000000e+00> : vector<8x256xf32>
    %170 = tpu.matmul %169, %167, %cst_135 {dimension_numbers = #tpu.dot_dimension_numbers<[1], [0], [0], [1], [0, 0, 1, 1], [], []>} : vector<8x8xf32>, vector<8x256xf32>, vector<8x256xf32> -> vector<8x256xf32>
    %171 = arith.addf %162, %170 : vector<8x256xf32>
    %c1_136 = arith.constant 1 : index
    %c0_137 = arith.constant 0 : index
    %c0_138 = arith.constant 0 : index
    %172 = vector.load %arg4[%c1_136, %c0_137, %c0_138] : memref<2x8x256xf32, #tpu.memory_space<vmem>>, vector<1x8x256xf32>
    %173 = vector.shape_cast %172 : vector<1x8x256xf32> to vector<8x256xf32>
    %174 = vector.shape_cast %171 : vector<8x256xf32> to vector<1x8x256xf32>
    tpu.vector_store %arg4[%c1_136, %c0_137, %c0_138], %174 {strides = array<i32>} : memref<2x8x256xf32, #tpu.memory_space<vmem>>, vector<1x8x256xf32>,
    %cst_139 = arith.constant dense<0.000000e+00> : vector<8xf32>
    %175 = vector.multi_reduction <add>, %171, %cst_139 [1] : vector<8x256xf32> to vector<8xf32>
    %176 = vector.shape_cast %175 : vector<8xf32> to vector<8x1xf32>
    %cst_140 = arith.constant 3.906250e-03 : f32
    %177 = vector.broadcast %cst_140 : f32 to vector<8x1xf32>
    %178 = arith.mulf %176, %177 : vector<8x1xf32>
    %179 = vector.broadcast %178 : vector<8x1xf32> to vector<8x256xf32>
    %180 = arith.subf %171, %179 : vector<8x256xf32>
    %181 = arith.mulf %180, %180 : vector<8x256xf32>
    %cst_141 = arith.constant dense<0.000000e+00> : vector<8xf32>
    %182 = vector.multi_reduction <add>, %181, %cst_141 [1] : vector<8x256xf32> to vector<8xf32>
    %183 = vector.shape_cast %182 : vector<8xf32> to vector<8x1xf32>
    %c1_142 = arith.constant 1 : index
    %c0_143 = arith.constant 0 : index
    %c0_144 = arith.constant 0 : index
    %184 = vector.load %arg5[%c1_142, %c0_143, %c0_144] : memref<2x8x2xf32, #tpu.memory_space<vmem>>, vector<1x8x1xf32>
    %185 = vector.shape_cast %184 : vector<1x8x1xf32> to vector<8x1xf32>
    %186 = vector.shape_cast %176 : vector<8x1xf32> to vector<1x8x1xf32>
    tpu.vector_store %arg5[%c1_142, %c0_143, %c0_144], %186 {strides = array<i32>} : memref<2x8x2xf32, #tpu.memory_space<vmem>>, vector<1x8x1xf32>,
    %c1_145 = arith.constant 1 : index
    %c0_146 = arith.constant 0 : index
    %c1_147 = arith.constant 1 : index
    %187 = vector.load %arg5[%c1_145, %c0_146, %c1_147] : memref<2x8x2xf32, #tpu.memory_space<vmem>>, vector<1x8x1xf32>
    %188 = vector.shape_cast %187 : vector<1x8x1xf32> to vector<8x1xf32>
    %189 = vector.shape_cast %183 : vector<8x1xf32> to vector<1x8x1xf32>
    tpu.vector_store %arg5[%c1_145, %c0_146, %c1_147], %189 {strides = array<i32>} : memref<2x8x2xf32, #tpu.memory_space<vmem>>, vector<1x8x1xf32>,
    return
  }
  func.func @transform_0(%arg0: i32) -> (i32, i32, i32) {
    %c0_i32 = arith.constant 0 : i32
    %c0_i32_0 = arith.constant 0 : i32
    %c0_i32_1 = arith.constant 0 : i32
    return %arg0, %c0_i32, %c0_i32_0 : i32, i32, i32
  }
  func.func @transform_1(%arg0: i32) -> (i32, i32, i32) {
    %c0_i32 = arith.constant 0 : i32
    %c0_i32_0 = arith.constant 0 : i32
    %c0_i32_1 = arith.constant 0 : i32
    %c0_i32_2 = arith.constant 0 : i32
    return %c0_i32, %c0_i32_0, %c0_i32_1 : i32, i32, i32
  }
  func.func @transform_2(%arg0: i32) -> (i32, i32, i32) {
    %c0_i32 = arith.constant 0 : i32
    %c0_i32_0 = arith.constant 0 : i32
    %c0_i32_1 = arith.constant 0 : i32
    %c0_i32_2 = arith.constant 0 : i32
    return %c0_i32, %c0_i32_0, %c0_i32_1 : i32, i32, i32
  }
  func.func @transform_3(%arg0: i32) -> (i32, i32, i32) {
    %c0_i32 = arith.constant 0 : i32
    %c0_i32_0 = arith.constant 0 : i32
    %c0_i32_1 = arith.constant 0 : i32
    return %arg0, %c0_i32, %c0_i32_0 : i32, i32, i32
  }
  func.func @transform_4(%arg0: i32) -> (i32, i32, i32) {
    %c0_i32 = arith.constant 0 : i32
    %c0_i32_0 = arith.constant 0 : i32
    %c0_i32_1 = arith.constant 0 : i32
    return %arg0, %c0_i32, %c0_i32_0 : i32, i32, i32
  }
}

</mosaic_0001>

<bundles_post_ra>
// kernel: residual_forward.5
= control target key start
LH: loop header
LB: loop body
LE: loop exit
PB: predicated region body
PF: predicated region fallthrough
CT: control target
= control target key end

     0   :  { %v66_v0 = vmov 0   ;;  %s117_s1 = inlined_call_operand.vmem [shape: f32[8,1], index: 1, kind: input, shape index: {}]   ;;  %s118_s2 = inlined_call_operand.vmem [shape: f32[8,1], index: 2, kind: input, shape index: {}]   ;;  %s119_s0 = inlined_call_operand.vmem [shape: f32[2,8,256], index: 0, kind: input, shape index: {}]   ;;  %s120_s3 = inlined_call_operand.vmem [shape: f32[2,8,256], index: 3, kind: output, shape index: {}]  }
   0x1   :  { %65 = vset.pattern.permute.xlu0 %v66_v0  ;;  %v14_v1 = vld [vmem:[%s117_s1] sm:$0xff]  ;;  %v17_v5 = vld [vmem:[%s119_s0 + $0x8] sm:$0xff]  ;;  %v60_v6 = vld [vmem:[%s119_s0 + $0x10] sm:$0xff] }
   0x2   :  { %20 = vperm.xlu0 %65, %v14_v1   ;;  %v15_v2 = vld [vmem:[%s118_s2] sm:$0xff]  ;;  %v61_v7 = vld [vmem:[%s119_s0 + $0x18] sm:$0xff] }
   0x3   :  { %v16_v3 = vld [vmem:[%s119_s0] sm:$0xff] }
   0x6   :  { %27 = vperm.xlu0 %65, %v15_v2  }
  0x81   :  { %v21_v4 = vpop.permute.xlu0 %20 }
  0x82   :  { %v23_v8 = vmul.f32 %v21_v4, %v16_v3  ;;  %v24_v9 = vmul.f32 %v21_v4, %v17_v5  ;;  %v43_v10 = vmul.f32 %v60_v6, %v21_v4  ;;  %v44_v11 = vmul.f32 %v61_v7, %v21_v4 }
  0x85   :  { %v28_v12 = vpop.permute.xlu0 %27 }
  0x86   :  { %v30_v13 = vadd.f32 %v28_v12, %v23_v8  ;;  %v31_v14 = vadd.f32 %v28_v12, %v24_v9  ;;  %v45_v15 = vadd.f32 %v43_v10, %v28_v12  ;;  %v46_v16 = vadd.f32 %v44_v11, %v28_v12 }
  0x88   :  { %vm32_vm0 = vcmp.gt.f32.partialorder %v30_v13, 0.0  ;;  %vm33_vm1 = vcmp.gt.f32.partialorder %v31_v14, 0.0  ;;  %v34_v17 = vmul.f32 0.1, %v30_v13  ;;  %v35_v18 = vmul.f32 0.1, %v31_v14 }
  0x89   :  { %vm47_vm2 = vcmp.gt.f32.partialorder %v45_v15, 0.0  ;;  %vm48_vm3 = vcmp.gt.f32.partialorder %v46_v16, 0.0  ;;  %v49_v19 = vmul.f32 0.1, %v45_v15  ;;  %v50_v20 = vmul.f32 0.1, %v46_v16 }
  0x8a   :  { %v36_v21 = vsel %vm32_vm0, %v30_v13, %v34_v17  ;;  %v37_v22 = vsel %vm33_vm1, %v31_v14, %v35_v18 }
  0x8b   :  { %38 = vst [vmem:[%s120_s3] sm:$0xff] %v36_v21  ;;  %39 = vst [vmem:[%s120_s3 + $0x8] sm:$0xff] %v37_v22  ;;  %v51_v23 = vsel %vm47_vm2, %v45_v15, %v49_v19  ;;  %v52_v24 = vsel %vm48_vm3, %v46_v16, %v50_v20 }
  0x8c   :  { %62 = vst [vmem:[%s120_s3 + $0x10] sm:$0xff] %v51_v23  ;;  %63 = vst [vmem:[%s120_s3 + $0x18] sm:$0xff] %v52_v24 }

// kernel: residual_forward.3
= control target key start
LH: loop header
LB: loop body
LE: loop exit
PB: predicated region body
PF: predicated region fallthrough
CT: control target
= control target key end

     0   :  { %v1882_v2 = vmov 0.0   ;;  %s1883_s19 = smov 16   ;;  %s1884_s24 = smov 17   ;;  %v22_v5 = vlaneseq  ;;  %vm66_vm2 = vcmask 64512   ;;  %vm906_vm9 = vcmask 7168   ;;  %s2209_s0 = inlined_call_operand.vmem [shape: f32[2,8,256], index: 0, kind: input, shape index: {}]   ;;  %s2210_s2 = inlined_call_operand.vmem [shape: f32[9,1,256], index: 2, kind: input, shape index: {}]   ;;  %s2211_s1 = inlined_call_operand.vmem [shape: f32[9,8,8], index: 1, kind: input, shape index: {}]   ;;  %s2212_s3 = inlined_call_operand.vmem [shape: f32[2,8,256], index: 3, kind: output, shape index: {0}]   ;;  %s2213_s4 = inlined_call_operand.vmem [shape: f32[2,8,2], index: 4, kind: output, shape index: {1}]  }
   0x1   :  { %v1919_v0 = vld [vmem:[%s2209_s0 + $0x10] sm:$0xff]  ;;  %v1924_v1 = vld [vmem:[%s2209_s0] sm:$0xff]  ;;  %134 = vmatprep.mubr.f32.mxu0 %v1882_v2  ;;  %1022 = vmatprep.mubr.f32.mxu1 %v1882_v2  ;;  %v1933_v3 = vld [vmem:[%s2209_s0 + $0x18] sm:$0xff]  ;;  %s1885_s25 = smov 15   ;;  %s1887_s26 = smov 127   ;;  %vm908_vm10 = vcmask 15368  }
   0x2   :  { %934 = vrot.lane.b32.xlu1 %v1919_v0, %s1883_s19  ;;  %42 = vrot.lane.b32.xlu0 %v1924_v1, %s1883_s19  ;;  %v1938_v4 = vld [vmem:[%s2209_s0 + $0x8] sm:$0xff]  ;;  %s1886_s0 = smov 1   ;;  %s1888_s27 = smov 113   ;;  %v30_v6 = vshrl.u32 %v22_v5, 7  ;;  %v1970_v7 = vand.u32 127, %v22_v5  ;;  %v41_v51 = vld [vmem:[%s2211_s1] sm:$0xff] }
   0x3   :  { %s1889_s28 = smov 112   ;;  %s1890_s29 = smov 111   ;;  %v1813_v10 = vld [vmem:[%s2210_s2 + $0x2] sm:$0x3]  ;;  %v27_v14 = vld [vmem:[%s2210_s2] sm:$0x3] }
   0x4   :  { %v1972_v8 = vsub.s32 0, %v30_v6  ;;  %v1974_v9 = vsub.s32 1, %v30_v6  ;;  %v1787_v11 = vld [vmem:[%s2210_s2 + $0x2] sm:$0x3]  ;;  %vm46_vm0 = vcmp.lt.s32.totalorder %v1970_v7, 16  ;;  %vm24_vm1 = vcmp.lt.s32.totalorder %v1970_v7, 17 }
   0x5   :  { %v919_v31 = vld [vmem:[%s2210_s2] sm:$0x3]  ;;  %v1788_v32 = vld [vmem:[%s2211_s1 + $0x8] sm:$0xff]  ;;  %v1791_v41 = vld [vmem:[%s2210_s2 + $0x4] sm:$0x3]  ;;  %vm219_vm3 = vcmp.lt.s32.totalorder %v1970_v7, 15 }
   0x6   :  { %936 = vrot.lane.b32.xlu1 %v1933_v3, %s1883_s19  ;;  %44 = vrot.lane.b32.xlu0 %v1938_v4, %s1883_s19  ;;  %v949_v15 = vrot.slane %v1813_v10, %v1974_v9  ;;  %v59_v16 = vrot.slane %v1787_v11, %v1974_v9  ;;  %v55_v17 = vrot.slane %v1787_v11, %v1972_v8  ;;  %v1817_v50 = vld [vmem:[%s2210_s2 + $0x4] sm:$0x3]  ;;  %v1794_v60 = vld [vmem:[%s2210_s2 + $0x6] sm:$0x3]  ;;  %vm319_vm4 = vcmp.lt.s32.totalorder %v1970_v7, 1 }
   0x7   :  { %v945_v18 = vrot.slane %v1813_v10, %v1972_v8  ;;  %v32_v21 = vrot.slane %v27_v14, %v1972_v8  ;;  %v36_v22 = vrot.slane %v27_v14, %v1974_v9  ;;  %v924_v37 = vrot.slane %v919_v31, %v1972_v8  ;;  %v1792_v14 = vld [vmem:[%s2211_s1 + $0x10] sm:$0xff] }
   0x8   :  { %v928_v40 = vrot.slane %v919_v31, %v1974_v9  ;;  %v228_v48 = vrot.slane %v1791_v41, %v1972_v8  ;;  %v232_v49 = vrot.slane %v1791_v41, %v1974_v9  ;;  %v1114_v56 = vrot.slane %v1817_v50, %v1972_v8  ;;  %v1795_v31 = vld [vmem:[%s2211_s1 + $0x18] sm:$0xff] }
   0x9   :  { %v1118_v59 = vrot.slane %v1817_v50, %v1974_v9  ;;  %v328_v11 = vrot.slane %v1794_v60, %v1972_v8  ;;  %vm497_vm5 = vcmp.lt.s32.totalorder %v1970_v7, 127  ;;  %vm597_vm6 = vcmp.lt.s32.totalorder %v1970_v7, 113 }
   0xa   :  { %20 = vrot.lane.b32.xlu1 %v1938_v4, %s1884_s24  ;;  %18 = vrot.lane.b32.xlu0 %v1924_v1, %s1884_s24  ;;  %vm697_vm7 = vcmp.lt.s32.totalorder %v1970_v7, 112  ;;  %vm797_vm8 = vcmp.lt.s32.totalorder %v1970_v7, 111  ;;  %v1809_v7 = vld [vmem:[%s2211_s1 + $0x40] sm:$0xff] }
   0xe   :  { %915 = vrot.lane.b32.xlu1 %v1933_v3, %s1884_s24  ;;  %913 = vrot.lane.b32.xlu0 %v1919_v0, %s1884_s24 }
  0x12   :  { %217 = vrot.lane.b32.xlu1 %v1938_v4, %s1885_s25  ;;  %215 = vrot.lane.b32.xlu0 %v1924_v1, %s1885_s25 }
  0x16   :  { %1105 = vrot.lane.b32.xlu1 %v1933_v3, %s1885_s25  ;;  %1103 = vrot.lane.b32.xlu0 %v1919_v0, %s1885_s25 }
  0x1a   :  { %317 = vrot.lane.b32.xlu1 %v1938_v4, %s1886_s0  ;;  %315 = vrot.lane.b32.xlu0 %v1924_v1, %s1886_s0 }
  0x1e   :  { %1202 = vrot.lane.b32.xlu1 %v1933_v3, %s1886_s0  ;;  %1200 = vrot.lane.b32.xlu0 %v1919_v0, %s1886_s0 }
  0x22   :  { %495 = vrot.lane.b32.xlu1 %v1938_v4, %s1887_s26  ;;  %493 = vrot.lane.b32.xlu0 %v1924_v1, %s1887_s26 }
  0x26   :  { %1376 = vrot.lane.b32.xlu1 %v1933_v3, %s1887_s26  ;;  %1374 = vrot.lane.b32.xlu0 %v1919_v0, %s1887_s26 }
  0x2a   :  { %595 = vrot.lane.b32.xlu1 %v1938_v4, %s1888_s27  ;;  %593 = vrot.lane.b32.xlu0 %v1924_v1, %s1888_s27 }
  0x2e   :  { %1473 = vrot.lane.b32.xlu1 %v1933_v3, %s1888_s27  ;;  %1471 = vrot.lane.b32.xlu0 %v1919_v0, %s1888_s27 }
  0x32   :  { %695 = vrot.lane.b32.xlu1 %v1938_v4, %s1889_s28  ;;  %693 = vrot.lane.b32.xlu0 %v1924_v1, %s1889_s28 }
  0x36   :  { %1570 = vrot.lane.b32.xlu1 %v1933_v3, %s1889_s28  ;;  %1568 = vrot.lane.b32.xlu0 %v1919_v0, %s1889_s28 }
  0x3a   :  { %795 = vrot.lane.b32.xlu1 %v1938_v4, %s1890_s29  ;;  %793 = vrot.lane.b32.xlu0 %v1924_v1, %s1890_s29 }
  0x3e   :  { %1667 = vrot.lane.b32.xlu1 %v1933_v3, %s1890_s29  ;;  %1665 = vrot.lane.b32.xlu0 %v1919_v0, %s1890_s29 }
  0x74   :  { %v935_v12 = vpop.permute.xlu1 %934  ;;  %v43_v13 = vpop.permute.xlu0 %42 }
  0x78   :  { %v937_v19 = vpop.permute.xlu1 %936  ;;  %v45_v20 = vpop.permute.xlu0 %44 }
  0x79   :  { %v939_v23 = vsel %vm46_vm0, %v937_v19, %v935_v12  ;;  %v48_v24 = vsel %vm46_vm0, %v45_v20, %v43_v13  ;;  %v938_v25 = vsel %vm46_vm0, %v935_v12, %v937_v19  ;;  %v47_v26 = vsel %vm46_vm0, %v43_v13, %v45_v20  ;;  %v1820_v13 = vld [vmem:[%s2210_s2 + $0x6] sm:$0x3] }
  0x7a   :  { %v953_v27 = vmul.f32 %v949_v15, %v938_v25  ;;  %v63_v28 = vmul.f32 %v59_v16, %v47_v26  ;;  %v62_v29 = vmul.f32 %v55_v17, %v48_v24  ;;  %v952_v30 = vmul.f32 %v945_v18, %v939_v23  ;;  %v1799_v23 = vld [vmem:[%s2210_s2 + $0xa] sm:$0x3] }
  0x7b   :  { %v332_v12 = vrot.slane %v1794_v60, %v1974_v9  ;;  %v1211_v19 = vrot.slane %v1820_v13, %v1972_v8 }
  0x7c   :  { %958 = vmatprep.subr.mxu1 %v953_v27  ;;  %v21_v33 = vpop.permute.xlu1 %20  ;;  %70 = vmatprep.subr.mxu0 %v63_v28  ;;  %v19_v34 = vpop.permute.xlu0 %18 }
  0x7d   :  { %v25_v35 = vsel %vm24_vm1, %v19_v34, %v21_v33  ;;  %v26_v36 = vsel %vm24_vm1, %v21_v33, %v19_v34  ;;  %71 = vmatpush1.msra.mxu0 %v62_v29  ;;  %959 = vmatpush1.msra.mxu1 %v952_v30  ;;  %v510_v30 = vrot.slane %v1799_v23, %v1974_v9 }
  0x7e   :  { %v39_v38 = vmul.f32 %v32_v21, %v26_v36  ;;  %v40_v39 = vmul.f32 %v36_v22, %v25_v35  ;;  %1789 = vmatmul.mubr.msk.f32.vlgmr.msra.gmra.mrb[0].mxu0 %vm66_vm2, %v1788_v32  ;;  %1815 = vmatmul.mubr.msk.f32.vlgmr.msra.gmra.mrb[0].mxu1 %vm66_vm2, %v1788_v32  ;;  %v1215_v22 = vrot.slane %v1820_v13, %v1974_v9  ;;  %v1825_v32 = vld [vmem:[%s2210_s2 + $0xa] sm:$0x3] }
  0x7f   :  { %208 = vmatprep.mubr.f32.mxu0 %v1882_v2  ;;  %1096 = vmatprep.mubr.f32.mxu1 %v1882_v2  ;;  %v1389_v36 = vrot.slane %v1825_v32, %v1974_v9 }
  0x80   :  { %v916_v42 = vpop.permute.xlu1 %915  ;;  %144 = vmatprep.subr.mxu0 %v40_v39  ;;  %v914_v43 = vpop.permute.xlu0 %913  ;;  %v1802_v39 = vld [vmem:[%s2210_s2 + $0xc] sm:$0x3] }
  0x81   :  { %v917_v44 = vsel %vm24_vm1, %v914_v43, %v916_v42  ;;  %v918_v45 = vsel %vm24_vm1, %v916_v42, %v914_v43  ;;  %145 = vmatpush1.msra.mxu0 %v39_v38  ;;  %v1385_v38 = vrot.slane %v1825_v32, %v1972_v8 }
  0x82   :  { %v931_v46 = vmul.f32 %v924_v37, %v918_v45  ;;  %v932_v47 = vmul.f32 %v928_v40, %v917_v44  ;;  %v506_v37 = vrot.slane %v1799_v23, %v1972_v8  ;;  %v610_v44 = vrot.slane %v1802_v39, %v1974_v9 }
  0x84   :  { %v218_v52 = vpop.permute.xlu1 %217  ;;  %1032 = vmatprep.subr.mxu1 %v932_v47  ;;  %v216_v53 = vpop.permute.xlu0 %215  ;;  %v1828_v47 = vld [vmem:[%s2210_s2 + $0xc] sm:$0x3] }
  0x85   :  { %v220_v54 = vsel %vm219_vm3, %v216_v53, %v218_v52  ;;  %v221_v55 = vsel %vm219_vm3, %v218_v52, %v216_v53  ;;  %1033 = vmatpush1.msra.mxu1 %v931_v46  ;;  %v1486_v52 = vrot.slane %v1828_v47, %v1974_v9  ;;  %v606_v53 = vrot.slane %v1802_v39, %v1972_v8 }
  0x86   :  { %v235_v57 = vmul.f32 %v228_v48, %v221_v55  ;;  %v236_v58 = vmul.f32 %v232_v49, %v220_v54  ;;  %1790 = vmatmul.mubr.msk.f32.vlgmr.msra.gmra.mrb[0].mxu0 %vm66_vm2, %v41_v51  ;;  %1816 = vmatmul.mubr.msk.f32.vlgmr.msra.gmra.mrb[0].mxu1 %vm66_vm2, %v41_v51  ;;  %v1482_v54 = vrot.slane %v1828_v47, %v1972_v8  ;;  %v1805_v55 = vld [vmem:[%s2210_s2 + $0xe] sm:$0x3] }
  0x87   :  { %306 = vmatprep.mubr.f32.mxu0 %v1882_v2  ;;  %1191 = vmatprep.mubr.f32.mxu1 %v1882_v2 }
  0x88   :  { %v1106_v61 = vpop.permute.xlu1 %1105  ;;  %242 = vmatprep.subr.mxu0 %v236_v58  ;;  %v1104_v62 = vpop.permute.xlu0 %1103 }
  0x89   :  { %v1107_v63 = vsel %vm219_vm3, %v1104_v62, %v1106_v61  ;;  %v1108_v5 = vsel %vm219_vm3, %v1106_v61, %v1104_v62  ;;  %243 = vmatpush1.msra.mxu0 %v235_v57  ;;  %v710_v62 = vrot.slane %v1805_v55, %v1974_v9 }
  0x8a   :  { %v1121_v6 = vmul.f32 %v1114_v56, %v1108_v5  ;;  %v1122_v10 = vmul.f32 %v1118_v59, %v1107_v63  ;;  %v1800_v5 = vld [vmem:[%s2211_s1 + $0x28] sm:$0xff] }
  0x8c   :  { %v318_v15 = vpop.permute.xlu1 %317  ;;  %1127 = vmatprep.subr.mxu1 %v1122_v10  ;;  %v316_v16 = vpop.permute.xlu0 %315  ;;  %v1831_v10 = vld [vmem:[%s2210_s2 + $0xe] sm:$0x3] }
  0x8d   :  { %v320_v17 = vsel %vm319_vm4, %v316_v16, %v318_v15  ;;  %v321_v18 = vsel %vm319_vm4, %v318_v15, %v316_v16  ;;  %1128 = vmatpush1.msra.mxu1 %v1121_v6  ;;  %v1583_v15 = vrot.slane %v1831_v10, %v1974_v9  ;;  %v706_v16 = vrot.slane %v1805_v55, %v1972_v8 }
  0x8e   :  { %v335_v20 = vmul.f32 %v328_v11, %v321_v18  ;;  %v336_v21 = vmul.f32 %v332_v12, %v320_v17  ;;  %1793 = vmatmul.mubr.msk.f32.vlgmr.msra.gmra.mrb[0].mxu0 %vm66_vm2, %v1792_v14  ;;  %1819 = vmatmul.mubr.msk.f32.vlgmr.msra.gmra.mrb[0].mxu1 %vm66_vm2, %v1792_v14  ;;  %v1579_v17 = vrot.slane %v1831_v10, %v1972_v8  ;;  %v1808_v18 = vld [vmem:[%s2210_s2 + $0x10] sm:$0x3] }
  0x8f   :  { %406 = vmatprep.mubr.f32.mxu0 %v1882_v2  ;;  %1288 = vmatprep.mubr.f32.mxu1 %v1882_v2 }
  0x90   :  { %v1203_v24 = vpop.permute.xlu1 %1202  ;;  %342 = vmatprep.subr.mxu0 %v336_v21  ;;  %v1201_v25 = vpop.permute.xlu0 %1200 }
  0x91   :  { %v1204_v26 = vsel %vm319_vm4, %v1201_v25, %v1203_v24  ;;  %v1205_v27 = vsel %vm319_vm4, %v1203_v24, %v1201_v25  ;;  %343 = vmatpush1.msra.mxu0 %v335_v20  ;;  %v810_v25 = vrot.slane %v1808_v18, %v1974_v9 }
  0x92   :  { %v1218_v28 = vmul.f32 %v1211_v19, %v1205_v27  ;;  %v1219_v29 = vmul.f32 %v1215_v22, %v1204_v26  ;;  %420 = vmatprep.subr.mxu0 %v1938_v4  ;;  %v1803_v27 = vld [vmem:[%s2211_s1 + $0x30] sm:$0xff] }
  0x94   :  { %1224 = vmatprep.subr.mxu1 %v1219_v29  ;;  %v496_v33 = vpop.permute.xlu1 %495  ;;  %v494_v34 = vpop.permute.xlu0 %493  ;;  %v1834_v29 = vld [vmem:[%s2210_s2 + $0x10] sm:$0x3] }
  0x95   :  { %1225 = vmatpush1.msra.mxu1 %v1218_v28  ;;  %v499_v35 = vsel %vm497_vm5, %v496_v33, %v494_v34  ;;  %v498_v40 = vsel %vm497_vm5, %v494_v34, %v496_v33  ;;  %v1680_v34 = vrot.slane %v1834_v29, %v1974_v9 }
  0x96   :  { %1796 = vmatmul.mubr.msk.f32.vlgmr.msra.gmra.mrb[0].mxu0 %vm66_vm2, %v1795_v31  ;;  %1822 = vmatmul.mubr.msk.f32.vlgmr.msra.gmra.mrb[0].mxu1 %vm66_vm2, %v1795_v31  ;;  %v514_v4 = vmul.f32 %v510_v30, %v499_v35  ;;  %v513_v45 = vmul.f32 %v506_v37, %v498_v40  ;;  %v806_v35 = vrot.slane %v1808_v18, %v1972_v8 }
  0x97   :  { %421 = vmatpush1.msra.mxu0 %v1924_v1  ;;  %1301 = vmatprep.subr.mxu1 %v1933_v3 }
  0x98   :  { %484 = vmatprep.mubr.f32.mxu0 %v1882_v2  ;;  %1302 = vmatpush1.msra.mxu1 %v1919_v0  ;;  %v1377_v41 = vpop.permute.xlu1 %1376  ;;  %v1375_v42 = vpop.permute.xlu0 %1374  ;;  %v1797_v0 = vld [vmem:[%s2211_s1 + $0x20] sm:$0xff] }
  0x99   :  { %1365 = vmatprep.mubr.f32.mxu1 %v1882_v2  ;;  %520 = vmatprep.subr.mxu0 %v514_v4  ;;  %v1378_v1 = vsel %vm497_vm5, %v1375_v42, %v1377_v41  ;;  %v1379_v3 = vsel %vm497_vm5, %v1377_v41, %v1375_v42  ;;  %v1676_v4 = vrot.slane %v1834_v29, %v1972_v8  ;;  %v1806_v8 = vld [vmem:[%s2211_s1 + $0x38] sm:$0xff] }
  0x9a   :  { %v1393_v43 = vmul.f32 %v1389_v36, %v1379_v3  ;;  %v1392_v46 = vmul.f32 %v1385_v38, %v1378_v1 }
  0x9c   :  { %v596_v48 = vpop.permute.xlu1 %595  ;;  %1398 = vmatprep.subr.mxu1 %v1393_v43  ;;  %v594_v49 = vpop.permute.xlu0 %593 }
  0x9d   :  { %v599_v50 = vsel %vm597_vm6, %v596_v48, %v594_v49  ;;  %v598_v56 = vsel %vm597_vm6, %v594_v49, %v596_v48 }
  0x9e   :  { %1798 = vmatmul.mubr.msk.f32.vlgmr.msra.gmra.mrb[0].mxu0 %vm66_vm2, %v1797_v0  ;;  %1824 = vmatmul.mubr.msk.f32.vlgmr.msra.gmra.mrb[0].mxu1 %vm66_vm2, %v1797_v0  ;;  %v614_v51 = vmul.f32 %v610_v44, %v599_v50  ;;  %v613_v63 = vmul.f32 %v606_v53, %v598_v56 }
  0x9f   :  { %521 = vmatpush1.msra.mxu0 %v513_v45  ;;  %1399 = vmatpush1.msra.mxu1 %v1392_v46 }
  0xa0   :  { %584 = vmatprep.mubr.f32.mxu0 %v1882_v2  ;;  %1462 = vmatprep.mubr.f32.mxu1 %v1882_v2  ;;  %v1474_v57 = vpop.permute.xlu1 %1473  ;;  %v1472_v58 = vpop.permute.xlu0 %1471 }
  0xa1   :  { %620 = vmatprep.subr.mxu0 %v614_v51  ;;  %v1475_v59 = vsel %vm597_vm6, %v1472_v58, %v1474_v57  ;;  %v1476_v60 = vsel %vm597_vm6, %v1474_v57, %v1472_v58 }
  0xa2   :  { %v1490_v61 = vmul.f32 %v1486_v52, %v1476_v60  ;;  %v1489_v6 = vmul.f32 %v1482_v54, %v1475_v59 }
  0xa4   :  { %v696_v11 = vpop.permute.xlu1 %695  ;;  %1495 = vmatprep.subr.mxu1 %v1490_v61  ;;  %v694_v12 = vpop.permute.xlu0 %693 }
  0xa5   :  { %v699_v13 = vsel %vm697_vm7, %v696_v11, %v694_v12  ;;  %v698_v19 = vsel %vm697_vm7, %v694_v12, %v696_v11 }
  0xa6   :  { %1801 = vmatmul.mubr.msk.f32.vlgmr.msra.gmra.mrb[0].mxu0 %vm66_vm2, %v1800_v5  ;;  %1827 = vmatmul.mubr.msk.f32.vlgmr.msra.gmra.mrb[0].mxu1 %vm66_vm2, %v1800_v5  ;;  %v714_v14 = vmul.f32 %v710_v62, %v699_v13  ;;  %v713_v26 = vmul.f32 %v706_v16, %v698_v19 }
  0xa7   :  { %621 = vmatpush1.msra.mxu0 %v613_v63  ;;  %1496 = vmatpush1.msra.mxu1 %v1489_v6 }
  0xa8   :  { %684 = vmatprep.mubr.f32.mxu0 %v1882_v2  ;;  %1559 = vmatprep.mubr.f32.mxu1 %v1882_v2  ;;  %v1571_v20 = vpop.permute.xlu1 %1570  ;;  %v1569_v21 = vpop.permute.xlu0 %1568 }
  0xa9   :  { %720 = vmatprep.subr.mxu0 %v714_v14  ;;  %v1572_v22 = vsel %vm697_vm7, %v1569_v21, %v1571_v20  ;;  %v1573_v23 = vsel %vm697_vm7, %v1571_v20, %v1569_v21 }
  0xaa   :  { %v1587_v24 = vmul.f32 %v1583_v15, %v1573_v23  ;;  %v1586_v28 = vmul.f32 %v1579_v17, %v1572_v22 }
  0xac   :  { %v796_v30 = vpop.permute.xlu1 %795  ;;  %1592 = vmatprep.subr.mxu1 %v1587_v24  ;;  %v794_v31 = vpop.permute.xlu0 %793 }
  0xad   :  { %v799_v32 = vsel %vm797_vm8, %v796_v30, %v794_v31  ;;  %v798_v36 = vsel %vm797_vm8, %v794_v31, %v796_v30 }
  0xae   :  { %1804 = vmatmul.mubr.msk.f32.vlgmr.msra.gmra.mrb[0].mxu0 %vm66_vm2, %v1803_v27  ;;  %1830 = vmatmul.mubr.msk.f32.vlgmr.msra.gmra.mrb[0].mxu1 %vm66_vm2, %v1803_v27  ;;  %v814_v33 = vmul.f32 %v810_v25, %v799_v32  ;;  %v813_v41 = vmul.f32 %v806_v35, %v798_v36 }
  0xaf   :  { %721 = vmatpush1.msra.mxu0 %v713_v26  ;;  %1593 = vmatpush1.msra.mxu1 %v1586_v28 }
  0xb0   :  { %784 = vmatprep.mubr.f32.mxu0 %v1882_v2  ;;  %1656 = vmatprep.mubr.f32.mxu1 %v1882_v2  ;;  %v1668_v37 = vpop.permute.xlu1 %1667  ;;  %v1666_v38 = vpop.permute.xlu0 %1665 }
  0xb1   :  { %820 = vmatprep.subr.mxu0 %v814_v33  ;;  %v1669_v39 = vsel %vm797_vm8, %v1666_v38, %v1668_v37  ;;  %v1670_v9 = vsel %vm797_vm8, %v1668_v37, %v1666_v38 }
  0xb2   :  { %v1684_v40 = vmul.f32 %v1680_v34, %v1670_v9  ;;  %v1683_v42 = vmul.f32 %v1676_v4, %v1669_v39 }
  0xb4   :  { %1689 = vmatprep.subr.mxu1 %v1684_v40 }
  0xb6   :  { %1807 = vmatmul.mubr.msk.f32.vlgmr.msra.gmra.mrb[0].mxu0 %vm66_vm2, %v1806_v8  ;;  %1833 = vmatmul.mubr.msk.f32.vlgmr.msra.gmra.mrb[0].mxu1 %vm66_vm2, %v1806_v8 }
  0xb7   :  { %821 = vmatpush1.msra.mxu0 %v813_v41  ;;  %1690 = vmatpush1.msra.mxu1 %v1683_v42 }
  0xb8   :  { %884 = vmatprep.mubr.f32.mxu0 %v1882_v2  ;;  %1753 = vmatprep.mubr.f32.mxu1 %v1882_v2 }
  0xbe   :  { %1810 = vmatmul.mubr.msk.f32.vlgmr.msra.gmra.mrb[0].mxu0 %vm66_vm2, %v1809_v7  ;;  %1836 = vmatmul.mubr.msk.f32.vlgmr.msra.gmra.mrb[0].mxu1 %vm66_vm2, %v1809_v7 }
 0x191   :  { %v886_v1 = vpop.f32.mrb[0].mxu0  ;;  %v1755_v3 = vpop.f32.mrb[0].mxu1 }
 0x192   :  { %893 = vst [vmem:[%s2212_s3] sm:$0xff] %v886_v1  ;;  %1837 = vst [vmem:[%s2212_s3 + $0x10] sm:$0xff] %v1755_v3  ;;  %v888_v43 = vpop.f32.mrb[1].mxu0  ;;  %v1757_v2 = vpop.f32.mrb[1].mxu1 }
 0x193   :  { %894 = vst [vmem:[%s2212_s3 + $0x8] sm:$0xff] %v888_v43  ;;  %1838 = vst [vmem:[%s2212_s3 + $0x18] sm:$0xff] %v1757_v2  ;;  %v895_v44 = vadd.f32 %v888_v43, %v886_v1  ;;  %v1765_v45 = vadd.f32 %v1757_v2, %v1755_v3 }
 0x195   :  { %896 = vadd.xlane.f32.xlu0 %v895_v44  ;;  %1766 = vadd.xlane.f32.xlu1 %v1765_v45 }
 0x222   :  { %v1767_v0 = vpop.xlane.xlu1 %1766  ;;  %v897_v46 = vpop.xlane.xlu0 %896 }
 0x223   :  { %v1768_v47 = vmul.f32 0.00390625, %v1767_v0  ;;  %1839 = vst.msk [vmem:[%s2213_s4 + $0x8] sm:$0xff] %vm906_vm9, %v1767_v0  ;;  %v898_v48 = vmul.f32 0.00390625, %v897_v46  ;;  %907 = vst.msk [vmem:[%s2213_s4] sm:$0xff] %vm906_vm9, %v897_v46 }
 0x225   :  { %v1769_v49 = vsub.f32 %v1755_v3, %v1768_v47  ;;  %v1770_v50 = vsub.f32 %v1757_v2, %v1768_v47  ;;  %v899_v51 = vsub.f32 %v886_v1, %v898_v48  ;;  %v900_v52 = vsub.f32 %v888_v43, %v898_v48 }
 0x227   :  { %v1771_v53 = vmul.f32 %v1769_v49, %v1769_v49  ;;  %v1772_v54 = vmul.f32 %v1770_v50, %v1770_v50  ;;  %v901_v55 = vmul.f32 %v899_v51, %v899_v51  ;;  %v902_v56 = vmul.f32 %v900_v52, %v900_v52 }
 0x229   :  { %v903_v57 = vadd.f32 %v902_v56, %v901_v55  ;;  %v1773_v58 = vadd.f32 %v1772_v54, %v1771_v53 }
 0x22b   :  { %904 = vadd.xlane.f32.xlu0 %v903_v57 }
 0x22f   :  { %1774 = vadd.xlane.f32.xlu0 %v1773_v58 }
 0x2b8   :  { %v905_v59 = vpop.xlane.xlu0 %904 }
 0x2b9   :  { %909 = vst.msk [vmem:[%s2213_s4] sm:$0xff] %vm908_vm10, %v905_v59 }
 0x2bc   :  { %v1775_v60 = vpop.xlane.xlu0 %1774 }
 0x2bd   :  { %1840 = vst.msk [vmem:[%s2213_s4 + $0x8] sm:$0xff] %vm908_vm10, %v1775_v60 }

// kernel: residual_forward.4
= control target key start
LH: loop header
LB: loop body
LE: loop exit
PB: predicated region body
PF: predicated region fallthrough
CT: control target
= control target key end

     0   :  { %v1922_v0 = vmov 0   ;;  %v1923_v17 = vmov 0.0   ;;  %s1926_s8 = smov 15   ;;  %s1927_s9 = smov 1   ;;  %v50_v26 = vlaneseq  ;;  %vm94_vm5 = vcmask 64512   ;;  %s2274_s1 = inlined_call_operand.vmem [shape: f32[8,1], index: 1, kind: input, shape index: {}]   ;;  %s2275_s2 = inlined_call_operand.vmem [shape: f32[8,1], index: 2, kind: input, shape index: {}]   ;;  %s2276_s0 = inlined_call_operand.vmem [shape: f32[2,8,256], index: 0, kind: input, shape index: {}]   ;;  %s2277_s4 = inlined_call_operand.vmem [shape: f32[9,1,256], index: 4, kind: input, shape index: {}]   ;;  %s2278_s3 = inlined_call_operand.vmem [shape: f32[9,8,8], index: 3, kind: input, shape index: {}]   ;;  %s2279_s5 = inlined_call_operand.vmem [shape: f32[2,8,256], index: 5, kind: output, shape index: {0}]   ;;  %s2280_s6 = inlined_call_operand.vmem [shape: f32[2,8,2], index: 6, kind: output, shape index: {1}]  }
   0x1   :  { %1921 = vset.pattern.permute.xlu0 %v1922_v0  ;;  %v22_v1 = vld [vmem:[%s2274_s1] sm:$0xff]  ;;  %v25_v5 = vld [vmem:[%s2276_s0 + $0x8] sm:$0xff]  ;;  %v1849_v6 = vld [vmem:[%s2276_s0 + $0x10] sm:$0xff]  ;;  %162 = vmatprep.mubr.f32.mxu0 %v1923_v17  ;;  %s1928_s10 = smov 127   ;;  %s1929_s11 = smov 113   ;;  %vm934_vm13 = vcmask 7168  }
   0x2   :  { %28 = vperm.xlu0 %1921, %v22_v1   ;;  %v23_v2 = vld [vmem:[%s2275_s2] sm:$0xff]  ;;  %v1850_v10 = vld [vmem:[%s2276_s0 + $0x18] sm:$0xff]  ;;  %1060 = vmatprep.mubr.f32.mxu1 %v1923_v17  ;;  %s1925_s2 = smov 17   ;;  %s1930_s12 = smov 112   ;;  %v58_v27 = vshrl.u32 %v50_v26, 7  ;;  %v2027_v28 = vand.u32 127, %v50_v26 }
   0x3   :  { %v24_v4 = vld [vmem:[%s2276_s0] sm:$0xff]  ;;  %s1924_s0 = smov 16   ;;  %s1931_s13 = smov 111   ;;  %v1826_v45 = vld [vmem:[%s2278_s3 + $0x8] sm:$0xff]  ;;  %vm936_vm14 = vcmask 15368  }
   0x4   :  { %v2029_v29 = vsub.s32 0, %v58_v27  ;;  %v2031_v30 = vsub.s32 1, %v58_v27  ;;  %v1825_v31 = vld [vmem:[%s2277_s4 + $0x2] sm:$0x3]  ;;  %vm74_vm4 = vcmp.lt.s32.totalorder %v2027_v28, 16  ;;  %vm52_vm6 = vcmp.lt.s32.totalorder %v2027_v28, 17 }
   0x5   :  { %v1851_v36 = vld [vmem:[%s2277_s4 + $0x2] sm:$0x3]  ;;  %v55_v46 = vld [vmem:[%s2277_s4] sm:$0x3]  ;;  %v1829_v1 = vld [vmem:[%s2277_s4 + $0x4] sm:$0x3] }
   0x6   :  { %35 = vperm.xlu0 %1921, %v23_v2   ;;  %v87_v34 = vrot.slane %v1825_v31, %v2031_v30  ;;  %v83_v35 = vrot.slane %v1825_v31, %v2029_v29  ;;  %v987_v43 = vrot.slane %v1851_v36, %v2031_v30  ;;  %v983_v44 = vrot.slane %v1851_v36, %v2029_v29  ;;  %v957_v55 = vld [vmem:[%s2277_s4] sm:$0x3] }
   0x7   :  { %v60_v52 = vrot.slane %v55_v46, %v2029_v29  ;;  %v64_v53 = vrot.slane %v55_v46, %v2031_v30  ;;  %v962_v62 = vrot.slane %v957_v55, %v2029_v29  ;;  %v966_v63 = vrot.slane %v957_v55, %v2031_v30  ;;  %v69_v0 = vld [vmem:[%s2278_s3] sm:$0xff]  ;;  %v1833_v46 = vld [vmem:[%s2278_s3 + $0x18] sm:$0xff]  ;;  %v1863_v55 = vld [vmem:[%s2277_s4 + $0xa] sm:$0x3] }
   0x8   :  { %vm247_vm7 = vcmp.lt.s32.totalorder %v2027_v28, 15  ;;  %vm347_vm8 = vcmp.lt.s32.totalorder %v2027_v28, 1  ;;  %vm525_vm9 = vcmp.lt.s32.totalorder %v2027_v28, 127  ;;  %vm625_vm10 = vcmp.lt.s32.totalorder %v2027_v28, 113 }
   0x9   :  { %vm725_vm11 = vcmp.lt.s32.totalorder %v2027_v28, 112  ;;  %vm825_vm12 = vcmp.lt.s32.totalorder %v2027_v28, 111 }
  0x81   :  { %v29_v3 = vpop.permute.xlu0 %28 }
  0x82   :  { %v31_v7 = vmul.f32 %v29_v3, %v24_v4  ;;  %v32_v8 = vmul.f32 %v29_v3, %v25_v5  ;;  %v941_v9 = vmul.f32 %v1849_v6, %v29_v3  ;;  %v942_v15 = vmul.f32 %v1850_v10, %v29_v3  ;;  %v1855_v10 = vld [vmem:[%s2277_s4 + $0x4] sm:$0x3] }
  0x85   :  { %v36_v11 = vpop.permute.xlu0 %35 }
  0x86   :  { %v38_v12 = vadd.f32 %v36_v11, %v31_v7  ;;  %v39_v13 = vadd.f32 %v36_v11, %v32_v8  ;;  %v943_v14 = vadd.f32 %v941_v9, %v36_v11  ;;  %v944_v21 = vadd.f32 %v942_v15, %v36_v11 }
  0x87   :  { %v256_v8 = vrot.slane %v1829_v1, %v2029_v29  ;;  %v260_v9 = vrot.slane %v1829_v1, %v2031_v30 }
  0x88   :  { %vm40_vm0 = vcmp.gt.f32.partialorder %v38_v12, 0.0  ;;  %v42_v16 = vmul.f32 0.1, %v38_v12  ;;  %vm945_vm1 = vcmp.gt.f32.partialorder %v943_v14, 0.0  ;;  %v947_v18 = vmul.f32 0.1, %v943_v14 }
  0x89   :  { %v43_v19 = vmul.f32 0.1, %v39_v13  ;;  %vm41_vm2 = vcmp.gt.f32.partialorder %v39_v13, 0.0  ;;  %v948_v24 = vmul.f32 0.1, %v944_v21  ;;  %vm946_vm3 = vcmp.gt.f32.partialorder %v944_v21, 0.0 }
  0x8a   :  { %v1987_v20 = vsel %vm40_vm0, %v38_v12, %v42_v16  ;;  %v1989_v22 = vsel %vm945_vm1, %v943_v14, %v947_v18  ;;  %v1152_v18 = vrot.slane %v1855_v10, %v2029_v29 }
  0x8b   :  { %70 = vrot.lane.b32.xlu1 %v1987_v20, %s1924_s0  ;;  %972 = vrot.lane.b32.xlu0 %v1989_v22, %s1924_s0  ;;  %v1993_v23 = vsel %vm41_vm2, %v39_v13, %v43_v19  ;;  %v1997_v25 = vsel %vm946_vm3, %v944_v21, %v948_v24  ;;  %v1156_v19 = vrot.slane %v1855_v10, %v2031_v30  ;;  %v1830_v21 = vld [vmem:[%s2278_s3 + $0x10] sm:$0xff]  ;;  %v1832_v24 = vld [vmem:[%s2277_s4 + $0x6] sm:$0x3] }
  0x8c   :  { %v360_v36 = vrot.slane %v1832_v24, %v2031_v30 }
  0x8f   :  { %72 = vrot.lane.b32.xlu1 %v1993_v23, %s1924_s0  ;;  %46 = vrot.lane.b32.xlu0 %v1987_v20, %s1925_s2 }
  0x93   :  { %974 = vrot.lane.b32.xlu1 %v1997_v25, %s1924_s0  ;;  %951 = vrot.lane.b32.xlu0 %v1989_v22, %s1925_s2 }
  0x97   :  { %48 = vrot.lane.b32.xlu1 %v1993_v23, %s1925_s2  ;;  %243 = vrot.lane.b32.xlu0 %v1987_v20, %s1926_s8 }
  0x9b   :  { %953 = vrot.lane.b32.xlu1 %v1997_v25, %s1925_s2  ;;  %1141 = vrot.lane.b32.xlu0 %v1989_v22, %s1926_s8 }
  0x9f   :  { %245 = vrot.lane.b32.xlu1 %v1993_v23, %s1926_s8  ;;  %343 = vrot.lane.b32.xlu0 %v1987_v20, %s1927_s9 }
  0xa3   :  { %1143 = vrot.lane.b32.xlu1 %v1997_v25, %s1926_s8  ;;  %1238 = vrot.lane.b32.xlu0 %v1989_v22, %s1927_s9 }
  0xa7   :  { %345 = vrot.lane.b32.xlu1 %v1993_v23, %s1927_s9  ;;  %521 = vrot.lane.b32.xlu0 %v1987_v20, %s1928_s10 }
  0xab   :  { %1240 = vrot.lane.b32.xlu1 %v1997_v25, %s1927_s9  ;;  %1412 = vrot.lane.b32.xlu0 %v1989_v22, %s1928_s10 }
  0xaf   :  { %523 = vrot.lane.b32.xlu1 %v1993_v23, %s1928_s10  ;;  %621 = vrot.lane.b32.xlu0 %v1987_v20, %s1929_s11 }
  0xb3   :  { %1414 = vrot.lane.b32.xlu1 %v1997_v25, %s1928_s10  ;;  %1509 = vrot.lane.b32.xlu0 %v1989_v22, %s1929_s11 }
  0xb7   :  { %623 = vrot.lane.b32.xlu1 %v1993_v23, %s1929_s11  ;;  %721 = vrot.lane.b32.xlu0 %v1987_v20, %s1930_s12 }
  0xbb   :  { %1511 = vrot.lane.b32.xlu1 %v1997_v25, %s1929_s11  ;;  %1606 = vrot.lane.b32.xlu0 %v1989_v22, %s1930_s12 }
  0xbf   :  { %723 = vrot.lane.b32.xlu1 %v1993_v23, %s1930_s12  ;;  %821 = vrot.lane.b32.xlu0 %v1987_v20, %s1931_s13 }
  0xc3   :  { %1608 = vrot.lane.b32.xlu1 %v1997_v25, %s1930_s12  ;;  %1703 = vrot.lane.b32.xlu0 %v1989_v22, %s1931_s13 }
  0xc7   :  { %823 = vrot.lane.b32.xlu1 %v1993_v23, %s1931_s13 }
  0xcb   :  { %1705 = vrot.lane.b32.xlu1 %v1997_v25, %s1931_s13 }
  0xfd   :  { %v71_v32 = vpop.permute.xlu1 %70  ;;  %v973_v33 = vpop.permute.xlu0 %972 }
 0x101   :  { %v73_v37 = vpop.permute.xlu1 %72  ;;  %v47_v38 = vpop.permute.xlu0 %46 }
 0x102   :  { %v76_v39 = vsel %vm74_vm4, %v73_v37, %v71_v32  ;;  %v75_v40 = vsel %vm74_vm4, %v71_v32, %v73_v37  ;;  %v1858_v37 = vld [vmem:[%s2277_s4 + $0x6] sm:$0x3] }
 0x103   :  { %v91_v41 = vmul.f32 %v87_v34, %v75_v40  ;;  %v90_v42 = vmul.f32 %v83_v35, %v76_v39  ;;  %v356_v35 = vrot.slane %v1832_v24, %v2029_v29 }
 0x105   :  { %98 = vmatprep.subr.mxu0 %v91_v41  ;;  %v975_v47 = vpop.permute.xlu1 %974  ;;  %v952_v48 = vpop.permute.xlu0 %951 }
 0x106   :  { %v977_v49 = vsel %vm74_vm4, %v975_v47, %v973_v33  ;;  %99 = vmatpush1.msra.mxu0 %v90_v42  ;;  %v976_v50 = vsel %vm74_vm4, %v973_v33, %v975_v47  ;;  %v1837_v47 = vld [vmem:[%s2277_s4 + $0xa] sm:$0x3] }
 0x107   :  { %1827 = vmatmul.mubr.msk.f32.vlgmr.msra.gmra.mrb[0].mxu0 %vm94_vm5, %v1826_v45  ;;  %v991_v51 = vmul.f32 %v987_v43, %v976_v50  ;;  %v990_v54 = vmul.f32 %v983_v44, %v977_v49  ;;  %v1249_v44 = vrot.slane %v1858_v37, %v2029_v29 }
 0x108   :  { %236 = vmatprep.mubr.f32.mxu0 %v1923_v17 }
 0x109   :  { %996 = vmatprep.subr.mxu1 %v991_v51  ;;  %v49_v56 = vpop.permute.xlu1 %48  ;;  %v244_v57 = vpop.permute.xlu0 %243 }
 0x10a   :  { %v53_v58 = vsel %vm52_vm6, %v47_v38, %v49_v56  ;;  %v54_v59 = vsel %vm52_vm6, %v49_v56, %v47_v38  ;;  %997 = vmatpush1.msra.mxu1 %v990_v54  ;;  %v538_v54 = vrot.slane %v1837_v47, %v2031_v30 }
 0x10b   :  { %v67_v60 = vmul.f32 %v60_v52, %v54_v59  ;;  %v68_v61 = vmul.f32 %v64_v53, %v53_v58  ;;  %1853 = vmatmul.mubr.msk.f32.vlgmr.msra.gmra.mrb[0].mxu1 %vm94_vm5, %v1826_v45  ;;  %v1253_v45 = vrot.slane %v1858_v37, %v2031_v30  ;;  %v534_v58 = vrot.slane %v1837_v47, %v2029_v29 }
 0x10c   :  { %1134 = vmatprep.mubr.f32.mxu1 %v1923_v17 }
 0x10d   :  { %172 = vmatprep.subr.mxu0 %v68_v61  ;;  %v954_v2 = vpop.permute.xlu1 %953  ;;  %v1142_v3 = vpop.permute.xlu0 %1141  ;;  %v1835_v61 = vld [vmem:[%s2278_s3 + $0x20] sm:$0xff] }
 0x10e   :  { %v955_v4 = vsel %vm52_vm6, %v952_v48, %v954_v2  ;;  %v956_v5 = vsel %vm52_vm6, %v954_v2, %v952_v48  ;;  %173 = vmatpush1.msra.mxu0 %v67_v60 }
 0x10f   :  { %v969_v6 = vmul.f32 %v962_v62, %v956_v5  ;;  %v970_v7 = vmul.f32 %v966_v63, %v955_v4  ;;  %1828 = vmatmul.mubr.msk.f32.vlgmr.msra.gmra.mrb[0].mxu0 %vm94_vm5, %v69_v0  ;;  %v1840_v62 = vld [vmem:[%s2277_s4 + $0xc] sm:$0x3] }
 0x110   :  { %334 = vmatprep.mubr.f32.mxu0 %v1923_v17  ;;  %v638_v4 = vrot.slane %v1840_v62, %v2031_v30  ;;  %v1866_v5 = vld [vmem:[%s2277_s4 + $0xc] sm:$0x3] }
 0x111   :  { %1070 = vmatprep.subr.mxu1 %v970_v7  ;;  %v246_v11 = vpop.permute.xlu1 %245  ;;  %v344_v12 = vpop.permute.xlu0 %343 }
 0x112   :  { %v248_v13 = vsel %vm247_vm7, %v244_v57, %v246_v11  ;;  %v249_v14 = vsel %vm247_vm7, %v246_v11, %v244_v57  ;;  %1071 = vmatpush1.msra.mxu1 %v969_v6 }
 0x113   :  { %v263_v15 = vmul.f32 %v256_v8, %v249_v14  ;;  %v264_v16 = vmul.f32 %v260_v9, %v248_v13  ;;  %1854 = vmatmul.mubr.msk.f32.vlgmr.msra.gmra.mrb[0].mxu1 %vm94_vm5, %v69_v0  ;;  %v634_v8 = vrot.slane %v1840_v62, %v2029_v29  ;;  %v1524_v13 = vrot.slane %v1866_v5, %v2031_v30  ;;  %v1838_v14 = vld [vmem:[%s2278_s3 + $0x28] sm:$0xff] }
 0x114   :  { %1229 = vmatprep.mubr.f32.mxu1 %v1923_v17 }
 0x115   :  { %270 = vmatprep.subr.mxu0 %v264_v16  ;;  %v1144_v26 = vpop.permute.xlu1 %1143  ;;  %v1239_v27 = vpop.permute.xlu0 %1238 }
 0x116   :  { %v1145_v31 = vsel %vm247_vm7, %v1142_v3, %v1144_v26  ;;  %v1146_v32 = vsel %vm247_vm7, %v1144_v26, %v1142_v3  ;;  %271 = vmatpush1.msra.mxu0 %v263_v15  ;;  %v1843_v15 = vld [vmem:[%s2277_s4 + $0xe] sm:$0x3] }
 0x117   :  { %v1159_v33 = vmul.f32 %v1152_v18, %v1146_v32  ;;  %v1160_v34 = vmul.f32 %v1156_v19, %v1145_v31  ;;  %1831 = vmatmul.mubr.msk.f32.vlgmr.msra.gmra.mrb[0].mxu0 %vm94_vm5, %v1830_v21  ;;  %v1520_v19 = vrot.slane %v1866_v5, %v2029_v29  ;;  %v1869_v31 = vld [vmem:[%s2277_s4 + $0xe] sm:$0x3] }
 0x118   :  { %434 = vmatprep.mubr.f32.mxu0 %v1923_v17 }
 0x119   :  { %1165 = vmatprep.subr.mxu1 %v1160_v34  ;;  %v346_v38 = vpop.permute.xlu1 %345  ;;  %v522_v39 = vpop.permute.xlu0 %521 }
 0x11a   :  { %v348_v40 = vsel %vm347_vm8, %v344_v12, %v346_v38  ;;  %v349_v41 = vsel %vm347_vm8, %v346_v38, %v344_v12  ;;  %1166 = vmatpush1.msra.mxu1 %v1159_v33 }
 0x11b   :  { %v363_v42 = vmul.f32 %v356_v35, %v349_v41  ;;  %v364_v43 = vmul.f32 %v360_v36, %v348_v40  ;;  %1857 = vmatmul.mubr.msk.f32.vlgmr.msra.gmra.mrb[0].mxu1 %vm94_vm5, %v1830_v21  ;;  %v734_v35 = vrot.slane %v1843_v15, %v2029_v29  ;;  %v1841_v40 = vld [vmem:[%s2278_s3 + $0x30] sm:$0xff] }
 0x11c   :  { %1326 = vmatprep.mubr.f32.mxu1 %v1923_v17  ;;  %v1846_v41 = vld [vmem:[%s2277_s4 + $0x10] sm:$0x3] }
 0x11d   :  { %370 = vmatprep.subr.mxu0 %v364_v43  ;;  %v1241_v48 = vpop.permute.xlu1 %1240  ;;  %v1413_v49 = vpop.permute.xlu0 %1412 }
 0x11e   :  { %v1242_v50 = vsel %vm347_vm8, %v1239_v27, %v1241_v48  ;;  %v1243_v51 = vsel %vm347_vm8, %v1241_v48, %v1239_v27  ;;  %371 = vmatpush1.msra.mxu0 %v363_v42  ;;  %v738_v27 = vrot.slane %v1843_v15, %v2031_v30 }
 0x11f   :  { %v1256_v52 = vmul.f32 %v1249_v44, %v1243_v51  ;;  %v1257_v53 = vmul.f32 %v1253_v45, %v1242_v50  ;;  %1834 = vmatmul.mubr.msk.f32.vlgmr.msra.gmra.mrb[0].mxu0 %vm94_vm5, %v1833_v46  ;;  %448 = vmatprep.subr.mxu0 %v1993_v23  ;;  %v1617_v44 = vrot.slane %v1869_v31, %v2029_v29  ;;  %v1872_v50 = vld [vmem:[%s2277_s4 + $0x10] sm:$0x3] }
 0x120   :  { %449 = vmatpush1.msra.mxu0 %v1987_v20  ;;  %512 = vmatprep.mubr.f32.mxu0 %v1923_v17  ;;  %v1427_v20 = vrot.slane %v1863_v55, %v2031_v30 }
 0x121   :  { %1262 = vmatprep.subr.mxu1 %v1257_v53  ;;  %v524_v56 = vpop.permute.xlu1 %523  ;;  %v622_v57 = vpop.permute.xlu0 %621  ;;  %v834_v53 = vrot.slane %v1846_v41, %v2029_v29 }
 0x122   :  { %v527_v23 = vsel %vm525_vm9, %v524_v56, %v522_v39  ;;  %1263 = vmatpush1.msra.mxu1 %v1256_v52  ;;  %v526_v59 = vsel %vm525_vm9, %v522_v39, %v524_v56  ;;  %v1621_v39 = vrot.slane %v1869_v31, %v2031_v30 }
 0x123   :  { %v542_v60 = vmul.f32 %v538_v54, %v527_v23  ;;  %1860 = vmatmul.mubr.msk.f32.vlgmr.msra.gmra.mrb[0].mxu1 %vm94_vm5, %v1833_v46  ;;  %1339 = vmatprep.subr.mxu1 %v1997_v25  ;;  %v541_v0 = vmul.f32 %v534_v58, %v526_v59  ;;  %v1423_v25 = vrot.slane %v1863_v55, %v2029_v29  ;;  %v1844_v58 = vld [vmem:[%s2278_s3 + $0x38] sm:$0xff] }
 0x124   :  { %1340 = vmatpush1.msra.mxu1 %v1989_v22  ;;  %1403 = vmatprep.mubr.f32.mxu1 %v1923_v17 }
 0x125   :  { %548 = vmatprep.subr.mxu0 %v542_v60  ;;  %v1415_v63 = vpop.permute.xlu1 %1414  ;;  %v1510_v1 = vpop.permute.xlu0 %1509 }
 0x126   :  { %v1417_v2 = vsel %vm525_vm9, %v1415_v63, %v1413_v49  ;;  %v1416_v22 = vsel %vm525_vm9, %v1413_v49, %v1415_v63  ;;  %v838_v49 = vrot.slane %v1846_v41, %v2031_v30 }
 0x127   :  { %v1431_v3 = vmul.f32 %v1427_v20, %v1417_v2  ;;  %1836 = vmatmul.mubr.msk.f32.vlgmr.msra.gmra.mrb[0].mxu0 %vm94_vm5, %v1835_v61  ;;  %v1430_v7 = vmul.f32 %v1423_v25, %v1416_v22  ;;  %v1714_v20 = vrot.slane %v1872_v50, %v2029_v29  ;;  %v1847_v29 = vld [vmem:[%s2278_s3 + $0x40] sm:$0xff] }
 0x128   :  { %549 = vmatpush1.msra.mxu0 %v541_v0  ;;  %612 = vmatprep.mubr.f32.mxu0 %v1923_v17 }
 0x129   :  { %1436 = vmatprep.subr.mxu1 %v1431_v3  ;;  %v624_v6 = vpop.permute.xlu1 %623  ;;  %v722_v10 = vpop.permute.xlu0 %721 }
 0x12a   :  { %v627_v9 = vsel %vm625_vm10, %v624_v6, %v622_v57  ;;  %v626_v11 = vsel %vm625_vm10, %v622_v57, %v624_v6  ;;  %v1718_v57 = vrot.slane %v1872_v50, %v2031_v30 }
 0x12b   :  { %v642_v12 = vmul.f32 %v638_v4, %v627_v9  ;;  %1862 = vmatmul.mubr.msk.f32.vlgmr.msra.gmra.mrb[0].mxu1 %vm94_vm5, %v1835_v61  ;;  %v641_v18 = vmul.f32 %v634_v8, %v626_v11 }
 0x12c   :  { %1437 = vmatpush1.msra.mxu1 %v1430_v7  ;;  %1500 = vmatprep.mubr.f32.mxu1 %v1923_v17 }
 0x12d   :  { %648 = vmatprep.subr.mxu0 %v642_v12  ;;  %v1512_v16 = vpop.permute.xlu1 %1511  ;;  %v1607_v32 = vpop.permute.xlu0 %1606 }
 0x12e   :  { %v1514_v21 = vsel %vm625_vm10, %v1512_v16, %v1510_v1  ;;  %v1513_v24 = vsel %vm625_vm10, %v1510_v1, %v1512_v16 }
 0x12f   :  { %v1528_v26 = vmul.f32 %v1524_v13, %v1514_v21  ;;  %1839 = vmatmul.mubr.msk.f32.vlgmr.msra.gmra.mrb[0].mxu0 %vm94_vm5, %v1838_v14  ;;  %v1527_v34 = vmul.f32 %v1520_v19, %v1513_v24 }
 0x130   :  { %649 = vmatpush1.msra.mxu0 %v641_v18  ;;  %712 = vmatprep.mubr.f32.mxu0 %v1923_v17 }
 0x131   :  { %1533 = vmatprep.subr.mxu1 %v1528_v26  ;;  %v724_v33 = vpop.permute.xlu1 %723  ;;  %v822_v46 = vpop.permute.xlu0 %821 }
 0x132   :  { %v727_v36 = vsel %vm725_vm11, %v724_v33, %v722_v10  ;;  %v726_v37 = vsel %vm725_vm11, %v722_v10, %v724_v33 }
 0x133   :  { %v742_v38 = vmul.f32 %v738_v27, %v727_v36  ;;  %1865 = vmatmul.mubr.msk.f32.vlgmr.msra.gmra.mrb[0].mxu1 %vm94_vm5, %v1838_v14  ;;  %v741_v43 = vmul.f32 %v734_v35, %v726_v37 }
 0x134   :  { %1534 = vmatpush1.msra.mxu1 %v1527_v34  ;;  %1597 = vmatprep.mubr.f32.mxu1 %v1923_v17 }
 0x135   :  { %748 = vmatprep.subr.mxu0 %v742_v38  ;;  %v1609_v42 = vpop.permute.xlu1 %1608  ;;  %v1704_v23 = vpop.permute.xlu0 %1703 }
 0x136   :  { %v1611_v45 = vsel %vm725_vm11, %v1609_v42, %v1607_v32  ;;  %v1610_v47 = vsel %vm725_vm11, %v1607_v32, %v1609_v42 }
 0x137   :  { %v1625_v48 = vmul.f32 %v1621_v39, %v1611_v45  ;;  %1842 = vmatmul.mubr.msk.f32.vlgmr.msra.gmra.mrb[0].mxu0 %vm94_vm5, %v1841_v40  ;;  %v1624_v52 = vmul.f32 %v1617_v44, %v1610_v47 }
 0x138   :  { %749 = vmatpush1.msra.mxu0 %v741_v43  ;;  %812 = vmatprep.mubr.f32.mxu0 %v1923_v17 }
 0x139   :  { %1630 = vmatprep.subr.mxu1 %v1625_v48  ;;  %v824_v51 = vpop.permute.xlu1 %823 }
 0x13a   :  { %v827_v54 = vsel %vm825_vm12, %v824_v51, %v822_v46  ;;  %v826_v55 = vsel %vm825_vm12, %v822_v46, %v824_v51 }
 0x13b   :  { %v842_v56 = vmul.f32 %v838_v49, %v827_v54  ;;  %1868 = vmatmul.mubr.msk.f32.vlgmr.msra.gmra.mrb[0].mxu1 %vm94_vm5, %v1841_v40  ;;  %v841_v60 = vmul.f32 %v834_v53, %v826_v55 }
 0x13c   :  { %1631 = vmatpush1.msra.mxu1 %v1624_v52  ;;  %1694 = vmatprep.mubr.f32.mxu1 %v1923_v17 }
 0x13d   :  { %848 = vmatprep.subr.mxu0 %v842_v56  ;;  %v1706_v59 = vpop.permute.xlu1 %1705 }
 0x13e   :  { %v1708_v61 = vsel %vm825_vm12, %v1706_v59, %v1704_v23  ;;  %v1707_v62 = vsel %vm825_vm12, %v1704_v23, %v1706_v59 }
 0x13f   :  { %v1722_v30 = vmul.f32 %v1718_v57, %v1708_v61  ;;  %1845 = vmatmul.mubr.msk.f32.vlgmr.msra.gmra.mrb[0].mxu0 %vm94_vm5, %v1844_v58  ;;  %v1721_v63 = vmul.f32 %v1714_v20, %v1707_v62 }
 0x140   :  { %849 = vmatpush1.msra.mxu0 %v841_v60  ;;  %912 = vmatprep.mubr.f32.mxu0 %v1923_v17 }
 0x141   :  { %1727 = vmatprep.subr.mxu1 %v1722_v30 }
 0x143   :  { %1871 = vmatmul.mubr.msk.f32.vlgmr.msra.gmra.mrb[0].mxu1 %vm94_vm5, %v1844_v58 }
 0x144   :  { %1728 = vmatpush1.msra.mxu1 %v1721_v63  ;;  %1791 = vmatprep.mubr.f32.mxu1 %v1923_v17 }
 0x147   :  { %1848 = vmatmul.mubr.msk.f32.vlgmr.msra.gmra.mrb[0].mxu0 %vm94_vm5, %v1847_v29 }
 0x14b   :  { %1874 = vmatmul.mubr.msk.f32.vlgmr.msra.gmra.mrb[0].mxu1 %vm94_vm5, %v1847_v29 }
 0x21a   :  { %v914_v28 = vpop.f32.mrb[0].mxu0 }
 0x21b   :  { %921 = vst [vmem:[%s2279_s5] sm:$0xff] %v914_v28  ;;  %v916_v0 = vpop.f32.mrb[1].mxu0 }
 0x21c   :  { %922 = vst [vmem:[%s2279_s5 + $0x8] sm:$0xff] %v916_v0  ;;  %v923_v1 = vadd.f32 %v916_v0, %v914_v28 }
 0x21e   :  { %924 = vadd.xlane.f32.xlu0 %v923_v1  ;;  %v1793_v25 = vpop.f32.mrb[0].mxu1 }
 0x21f   :  { %1875 = vst [vmem:[%s2279_s5 + $0x10] sm:$0xff] %v1793_v25  ;;  %v1795_v17 = vpop.f32.mrb[1].mxu1 }
 0x220   :  { %1876 = vst [vmem:[%s2279_s5 + $0x18] sm:$0xff] %v1795_v17  ;;  %v1803_v2 = vadd.f32 %v1795_v17, %v1793_v25 }
 0x222   :  { %1804 = vadd.xlane.f32.xlu1 %v1803_v2 }
 0x2ab   :  { %v925_v22 = vpop.xlane.xlu0 %924 }
 0x2ac   :  { %v926_v3 = vmul.f32 0.00390625, %v925_v22  ;;  %935 = vst.msk [vmem:[%s2280_s6] sm:$0xff] %vm934_vm13, %v925_v22 }
 0x2ae   :  { %v927_v4 = vsub.f32 %v914_v28, %v926_v3  ;;  %v928_v5 = vsub.f32 %v916_v0, %v926_v3 }
 0x2af   :  { %v1805_v6 = vpop.xlane.xlu1 %1804 }
 0x2b0   :  { %v1806_v7 = vmul.f32 0.00390625, %v1805_v6  ;;  %1877 = vst.msk [vmem:[%s2280_s6 + $0x8] sm:$0xff] %vm934_vm13, %v1805_v6  ;;  %v929_v8 = vmul.f32 %v927_v4, %v927_v4  ;;  %v930_v9 = vmul.f32 %v928_v5, %v928_v5 }
 0x2b2   :  { %v1807_v10 = vsub.f32 %v1793_v25, %v1806_v7  ;;  %v1808_v11 = vsub.f32 %v1795_v17, %v1806_v7  ;;  %v931_v12 = vadd.f32 %v930_v9, %v929_v8 }
 0x2b4   :  { %v1809_v13 = vmul.f32 %v1807_v10, %v1807_v10  ;;  %v1810_v14 = vmul.f32 %v1808_v11, %v1808_v11  ;;  %932 = vadd.xlane.f32.xlu0 %v931_v12 }
 0x2b6   :  { %v1811_v15 = vadd.f32 %v1810_v14, %v1809_v13 }
 0x2b8   :  { %1812 = vadd.xlane.f32.xlu0 %v1811_v15 }
 0x341   :  { %v933_v16 = vpop.xlane.xlu0 %932 }
 0x342   :  { %937 = vst.msk [vmem:[%s2280_s6] sm:$0xff] %vm936_vm14, %v933_v16 }
 0x345   :  { %v1813_v18 = vpop.xlane.xlu0 %1812 }
 0x346   :  { %1878 = vst.msk [vmem:[%s2280_s6 + $0x8] sm:$0xff] %vm936_vm14, %v1813_v18 }

</bundles_post_ra>
